<compile_context>
chip_gen: v5e
topology: v5e:2x2
jax: 0.10.0
libtpu: 0.0.40
codegen_flags: <defaults>
</compile_context>

<pallas_src>
import jax
import jax.numpy as jnp
from jax.experimental import pallas as pl
from jax.experimental.pallas import tpu as pltpu


# --------------------------------------------------------------------------- kernel

def _conv_block(x, padx, padlab, lab_m, fp_m, bin_m, vecs):
    """One ConvBlock on a lane-packed (H, W*C) activation value."""
    H, L = x.shape

    # Write the activation into the halo-padded scratch (halo rows already zero).
    padx[1:H + 1, :] = x

    # LAB difference depthwise conv (f32: feeds the sign threshold) and the fp branch
    # (bf16: 1x1 conv composed with the grouped 3x3) as three accumulating per-tap
    # dots; each tap's H-shift is a static sublane-offset slice of the padded scratch.
    d = None
    acc = None
    for dh in range(3):
        xs = padx[dh:dh + H, :]
        dd = jnp.dot(xs, lab_m[dh], preferred_element_type=jnp.float32)
        aa = jnp.dot(xs.astype(jnp.bfloat16), fp_m[dh],
                     preferred_element_type=jnp.float32)
        d = dd if d is None else d + dd
        acc = aa if acc is None else acc + aa

    # Hard argmax binarization to {-1, +1} (ties -> slot 0 -> -1, as torch.argmax).
    lab = jnp.where(d + vecs[0:1, :] > 0.0, 1.0, -1.0).astype(jnp.bfloat16)

    # Binary conv branch on the binarized activation (Scale folded into bin_m).
    padlab[1:H + 1, :] = lab
    for dh in range(3):
        acc = acc + jnp.dot(padlab[dh:dh + H, :], bin_m[dh],
                            preferred_element_type=jnp.float32)

    # PReLU(path0 + path1 + path2) + residual (bias / alpha are rows of vecs).
    s = acc + vecs[1:2, :]
    act = jnp.where(s >= 0.0, s, vecs[2:3, :] * s)
    return act + x


def _resblock_kernel(x_ref,
                     lab_m1, fp_m1, bin_m1, vecs1,
                     lab_m2, fp_m2, bin_m2, vecs2,
                     o_ref, padx, padlab):
    H, L = x_ref.shape

    # Zero only the one-row halos (interiors are fully overwritten each ConvBlock).
    # NOTE: do NOT hoist this under pl.when(program_id == 0): with
    # dimension_semantics=("parallel",) the second TensorCore never runs step 0.
    padx[0:1, :] = jnp.zeros((1, L), jnp.float32)
    padx[H + 1:H + 2, :] = jnp.zeros((1, L), jnp.float32)
    padlab[0:1, :] = jnp.zeros((1, L), jnp.bfloat16)
    padlab[H + 1:H + 2, :] = jnp.zeros((1, L), jnp.bfloat16)

    x = x_ref[...]
    x = _conv_block(x, padx, padlab, lab_m1, fp_m1, bin_m1, vecs1)
    x = _conv_block(x, padx, padlab, lab_m2, fp_m2, bin_m2, vecs2)
    o_ref[...] = x.astype(o_ref.dtype)


# ------------------------------------------------------------------------- wrapper

def residual_block_apply(x_packed, p1, p2):
    """x_packed: (N, H, W*C) float32, lane-packed NHWC.

    Chain this across consecutive ResidualBlocks to keep the packed layout and avoid
    per-block NCHW<->packed transposes; `residual_block` converts at the boundary."""
    N, H, L = x_packed.shape
    params = [p1["lab_m"], p1["fp_m"], p1["bin_m"], p1["vecs"],
              p2["lab_m"], p2["fp_m"], p2["bin_m"], p2["vecs"]]

    act_spec = pl.BlockSpec((None, H, L), lambda n: (n, 0, 0))

    def const_spec(shape):          # weights: same block every grid step -> resident
        nd = len(shape)
        return pl.BlockSpec(shape, lambda n, _nd=nd: (0,) * _nd)

    # Explicit VMEM budget: resident weights (+ pipelining) plus activation blocks,
    # with headroom but kept below v7x's 64 MiB physical VMEM.
    wbytes = sum(int(p.size) * p.dtype.itemsize for p in params)
    abytes = (H + 2) * L * 4 * 8
    vmem_limit = int(min(56 * 1024 * 1024,
                         max(16 * 1024 * 1024, 4 * wbytes + abytes)))

    return pl.pallas_call(
        _resblock_kernel,
        out_shape=jax.ShapeDtypeStruct((N, H, L), jnp.float32),
        grid=(N,),
        in_specs=[act_spec] + [const_spec(p.shape) for p in params],
        out_specs=act_spec,
        scratch_shapes=[pltpu.VMEM((H + 2, L), jnp.float32),    # halo-padded x
                        pltpu.VMEM((H + 2, L), jnp.bfloat16)],  # halo-padded lab (±1)
        compiler_params=pltpu.CompilerParams(
            dimension_semantics=("parallel",),
            vmem_limit_bytes=vmem_limit),
    )(x_packed, *params)


def residual_block(x_nchw, packed_params_list):
    """ResidualBlock.forward (two ConvBlocks). NCHW in / NCHW out."""
    N, C, H, W = x_nchw.shape
    L = W * C
    assert L % 128 == 0, "lane-dense layout requires W*C to be a multiple of 128"
    x = jnp.transpose(x_nchw, (0, 2, 3, 1)).reshape(N, H, L).astype(jnp.float32)
    p1, p2 = packed_params_list
    y = residual_block_apply(x, p1, p2)
    return jnp.transpose(y.reshape(N, H, W, C), (0, 3, 1, 2))


# ----------------------------------------------------------- parameter construction

def init_convblock_params(key, C, group_size):
    """Deterministic synthetic parameters in the PyTorch module's native shapes."""
    ks = jax.random.split(key, 6)
    return dict(
        lab_w=jax.random.normal(ks[0], (2 * C, 1, 3, 3), jnp.float32) * 0.1,
        lab_b=jax.random.normal(ks[1], (2 * C,), jnp.float32) * 0.1,
        bin_w=jax.random.normal(ks[2], (C, C, 3, 3), jnp.float32) * 0.1,
        bin_b=jax.random.normal(ks[3], (C,), jnp.float32) * 0.1,
        w1x1=jax.random.normal(ks[4], (C, C, 1, 1), jnp.float32) * 0.1,
        dw_w=jax.random.normal(ks[5], (C, group_size, 3, 3), jnp.float32) * 0.1,
        scale_mean=jnp.zeros((C,), jnp.float32),      # Scale.mean init
        scale_var=jnp.ones((C,), jnp.float32),        # Scale.variance init
        prelu_a=jnp.full((C,), 0.25, jnp.float32),    # nn.PReLU default
    )


def pack_convblock_params(raw, W):
    """Fold LAB-diff / Scale / bias / 1x1 conv / grouped conv / W-shifts into the
    lane-packed operands consumed by the kernel (runs once, wrapper side)."""
    C = raw["bin_b"].shape[0]
    gs = raw["dw_w"].shape[1]
    L = W * C

    def tile_lane(v):                               # (C,) -> (W*C,), lane = w*C + c
        return jnp.tile(v, W)

    # LAB as a single difference depthwise conv: slot1 - slot0.
    w_slot0 = raw["lab_w"][0::2, 0]                 # (C,3,3)  out channel 2c
    w_slot1 = raw["lab_w"][1::2, 0]                 # (C,3,3)  out channel 2c+1
    d_w = w_slot1 - w_slot0
    d_b = raw["lab_b"][1::2] - raw["lab_b"][0::2]
    eye_c = jnp.eye(C, dtype=jnp.float32)
    wt_lab = eye_c[None, None] * jnp.transpose(d_w, (1, 2, 0))[:, :, None, :]  # (3,3,Ci,Co)

    # BinaryConv2d: per-out-channel L1 scale * sign(W), with Scale.variance folded in.
    alpha_l1 = jnp.mean(jnp.abs(raw["bin_w"]), axis=(1, 2, 3))                 # (C,)
    bin_q = (alpha_l1 * raw["scale_var"])[:, None, None, None] * jnp.sign(raw["bin_w"])
    wt_bin = jnp.transpose(bin_q, (2, 3, 1, 0))                                # (3,3,Ci,Co)

    # fp path: grouped 3x3 (dense block-diagonal) composed with the 1x1 conv; the
    # 1x1 path itself is absorbed into the center tap.
    w1x1_m = raw["w1x1"][:, :, 0, 0].T                                         # (Ci,Co)
    wd = jnp.zeros((3, 3, C, C), jnp.float32)
    for o in range(C):
        g = o // gs
        for j in range(gs):
            wd = wd.at[:, :, g * gs + j, o].set(raw["dw_w"][o, j])
    wt_fp = jnp.einsum("im,xymo->xyio", w1x1_m, wd)                            # (3,3,Ci,Co)
    wt_fp = wt_fp.at[1, 1].add(w1x1_m)

    # Fold the W-shift of every tap into block-banded (L, L) channel-mixing matrices,
    # one per H tap -> (3, L, L) (the kernel issues one accumulating dot per H tap).
    def band_stack(wt, dtype):                      # wt: (3,3,Ci,Co)
        mats = []
        for dh in range(3):
            m = jnp.zeros((L, L), jnp.float32)
            for dw in range(3):
                shift = jnp.eye(W, k=-(dw - 1), dtype=jnp.float32)
                m = m + jnp.kron(shift, wt[dh, dw])
            mats.append(m)
        return jnp.stack(mats, axis=0).astype(dtype)

    fused_bias = raw["scale_var"] * raw["bin_b"] + raw["scale_mean"]
    vecs = jnp.stack([tile_lane(d_b), tile_lane(fused_bias),
                      tile_lane(raw["prelu_a"])], axis=0).astype(jnp.float32)

    return dict(
        lab_m=band_stack(wt_lab, jnp.float32),    # f32: feeds the sign threshold
        fp_m=band_stack(wt_fp, jnp.bfloat16),     # bf16: MXU-native
        bin_m=band_stack(wt_bin, jnp.bfloat16),   # bf16: MXU-native
        vecs=vecs,                                # rows: lab_db, fused bias, prelu alpha
    )


if __name__ == "__main__":
    key = jax.random.PRNGKey(0)
    kx, k1, k2 = jax.random.split(key, 3)
    N, C, H, W = 2, 8, 16, 16          # W*C = 128 -> exactly one full lane row per image row
    group_size = 4
    x = jax.random.normal(kx, (N, C, H, W), jnp.float32)
    p1 = pack_convblock_params(init_convblock_params(k1, C, group_size), W)
    p2 = pack_convblock_params(init_convblock_params(k2, C, group_size), W)

    out = residual_block(x, [p1, p2])
    out = jax.block_until_ready(out)

    assert out.shape == (N, C, H, W)
    assert bool(jnp.all(jnp.isfinite(out)))
    print("KERNEL_OK")
</pallas_src>

<mosaic_0001>
module attributes {stable_mosaic.version = 11 : i64} {
  func.func @_resblock_kernel(%arg0: i32, %arg1: memref<1x16x128xf32, #tpu.memory_space<vmem>>, %arg2: memref<3x128x128xf32, #tpu.memory_space<vmem>>, %arg3: memref<3x128x128xbf16, #tpu.memory_space<vmem>>, %arg4: memref<3x128x128xbf16, #tpu.memory_space<vmem>>, %arg5: memref<3x128xf32, #tpu.memory_space<vmem>>, %arg6: memref<3x128x128xf32, #tpu.memory_space<vmem>>, %arg7: memref<3x128x128xbf16, #tpu.memory_space<vmem>>, %arg8: memref<3x128x128xbf16, #tpu.memory_space<vmem>>, %arg9: memref<3x128xf32, #tpu.memory_space<vmem>>, %arg10: memref<1x16x128xf32, #tpu.memory_space<vmem>>, %arg11: memref<18x128xf32, #tpu.memory_space<vmem>>, %arg12: memref<18x128xbf16, #tpu.memory_space<vmem>>) attributes {dimension_semantics = [#tpu.dimension_semantics<parallel>], iteration_bounds = array<i64: 2>, scalar_prefetch = 0 : i64, scratch_operands = 2 : i64, tpu.core_type = #tpu.core_type<tc>, window_params = [{transform_indices = @transform_0, window_bounds = array<i64: 1, 16, 128>}, {pipeline_mode = #tpu.pipeline_mode<synchronous>, transform_indices = @transform_1, window_bounds = array<i64: 3, 128, 128>}, {pipeline_mode = #tpu.pipeline_mode<synchronous>, transform_indices = @transform_2, window_bounds = array<i64: 3, 128, 128>}, {pipeline_mode = #tpu.pipeline_mode<synchronous>, transform_indices = @transform_3, window_bounds = array<i64: 3, 128, 128>}, {pipeline_mode = #tpu.pipeline_mode<synchronous>, transform_indices = @transform_4, window_bounds = array<i64: 3, 128>}, {pipeline_mode = #tpu.pipeline_mode<synchronous>, transform_indices = @transform_5, window_bounds = array<i64: 3, 128, 128>}, {pipeline_mode = #tpu.pipeline_mode<synchronous>, transform_indices = @transform_6, window_bounds = array<i64: 3, 128, 128>}, {pipeline_mode = #tpu.pipeline_mode<synchronous>, transform_indices = @transform_7, window_bounds = array<i64: 3, 128, 128>}, {pipeline_mode = #tpu.pipeline_mode<synchronous>, transform_indices = @transform_8, window_bounds = array<i64: 3, 128>}, {transform_indices = @transform_9, window_bounds = array<i64: 1, 16, 128>}]} {
    %cst = arith.constant 0.000000e+00 : f32
    %0 = vector.broadcast %cst : f32 to vector<1x128xf32>
    %c0 = arith.constant 0 : index
    %c0_0 = arith.constant 0 : index
    %1 = vector.load %arg11[%c0, %c0_0] : memref<18x128xf32, #tpu.memory_space<vmem>>, vector<1x128xf32>
    tpu.vector_store %arg11[%c0, %c0_0], %0 {strides = array<i32>} : memref<18x128xf32, #tpu.memory_space<vmem>>, vector<1x128xf32>,
    %cst_1 = arith.constant 0.000000e+00 : f32
    %2 = vector.broadcast %cst_1 : f32 to vector<1x128xf32>
    %c17 = arith.constant 17 : index
    %c0_2 = arith.constant 0 : index
    %3 = vector.load %arg11[%c17, %c0_2] : memref<18x128xf32, #tpu.memory_space<vmem>>, vector<1x128xf32>
    tpu.vector_store %arg11[%c17, %c0_2], %2 {strides = array<i32>} : memref<18x128xf32, #tpu.memory_space<vmem>>, vector<1x128xf32>,
    %cst_3 = arith.constant 0.000000e+00 : bf16
    %4 = vector.broadcast %cst_3 : bf16 to vector<1x128xbf16>
    %c0_4 = arith.constant 0 : index
    %c0_5 = arith.constant 0 : index
    %5 = vector.load %arg12[%c0_4, %c0_5] : memref<18x128xbf16, #tpu.memory_space<vmem>>, vector<1x128xbf16>
    tpu.vector_store %arg12[%c0_4, %c0_5], %4 {strides = array<i32>} : memref<18x128xbf16, #tpu.memory_space<vmem>>, vector<1x128xbf16>,
    %cst_6 = arith.constant 0.000000e+00 : bf16
    %6 = vector.broadcast %cst_6 : bf16 to vector<1x128xbf16>
    %c17_7 = arith.constant 17 : index
    %c0_8 = arith.constant 0 : index
    %7 = vector.load %arg12[%c17_7, %c0_8] : memref<18x128xbf16, #tpu.memory_space<vmem>>, vector<1x128xbf16>
    tpu.vector_store %arg12[%c17_7, %c0_8], %6 {strides = array<i32>} : memref<18x128xbf16, #tpu.memory_space<vmem>>, vector<1x128xbf16>,
    %c0_9 = arith.constant 0 : index
    %c0_10 = arith.constant 0 : index
    %c0_11 = arith.constant 0 : index
    %8 = vector.load %arg1[%c0_9, %c0_10, %c0_11] : memref<1x16x128xf32, #tpu.memory_space<vmem>>, vector<1x16x128xf32>
    %9 = vector.shape_cast %8 : vector<1x16x128xf32> to vector<16x128xf32>
    %c1 = arith.constant 1 : index
    %c0_12 = arith.constant 0 : index
    %10 = vector.load %arg11[%c1, %c0_12] : memref<18x128xf32, #tpu.memory_space<vmem>>, vector<16x128xf32>
    tpu.vector_store %arg11[%c1, %c0_12], %9 {strides = array<i32>} : memref<18x128xf32, #tpu.memory_space<vmem>>, vector<16x128xf32>,
    %c0_13 = arith.constant 0 : index
    %c0_14 = arith.constant 0 : index
    %11 = vector.load %arg11[%c0_13, %c0_14] : memref<18x128xf32, #tpu.memory_space<vmem>>, vector<16x128xf32>
    %c0_15 = arith.constant 0 : index
    %c0_16 = arith.constant 0 : index
    %c0_17 = arith.constant 0 : index
    %12 = vector.load %arg2[%c0_15, %c0_16, %c0_17] : memref<3x128x128xf32, #tpu.memory_space<vmem>>, vector<1x128x128xf32>
    %13 = vector.shape_cast %12 : vector<1x128x128xf32> to vector<128x128xf32>
    %cst_18 = arith.constant dense<0.000000e+00> : vector<16x128xf32>
    %14 = tpu.matmul %11, %13, %cst_18 {dimension_numbers = #tpu.dot_dimension_numbers<[1], [0], [0], [1], [0, 0, 1, 1], [], []>} : vector<16x128xf32>, vector<128x128xf32>, vector<16x128xf32> -> vector<16x128xf32>
    %15 = arith.truncf %11 : vector<16x128xf32> to vector<16x128xbf16>
    %c0_19 = arith.constant 0 : index
    %c0_20 = arith.constant 0 : index
    %c0_21 = arith.constant 0 : index
    %16 = vector.load %arg3[%c0_19, %c0_20, %c0_21] : memref<3x128x128xbf16, #tpu.memory_space<vmem>>, vector<1x128x128xbf16>
    %17 = vector.shape_cast %16 : vector<1x128x128xbf16> to vector<128x128xbf16>
    %cst_22 = arith.constant dense<0.000000e+00> : vector<16x128xf32>
    %18 = tpu.matmul %15, %17, %cst_22 {dimension_numbers = #tpu.dot_dimension_numbers<[1], [0], [0], [1], [0, 0, 1, 1], [], []>} : vector<16x128xbf16>, vector<128x128xbf16>, vector<16x128xf32> -> vector<16x128xf32>
    %c1_23 = arith.constant 1 : index
    %c0_24 = arith.constant 0 : index
    %19 = vector.load %arg11[%c1_23, %c0_24] : memref<18x128xf32, #tpu.memory_space<vmem>>, vector<16x128xf32>
    %c1_25 = arith.constant 1 : index
    %c0_26 = arith.constant 0 : index
    %c0_27 = arith.constant 0 : index
    %20 = vector.load %arg2[%c1_25, %c0_26, %c0_27] : memref<3x128x128xf32, #tpu.memory_space<vmem>>, vector<1x128x128xf32>
    %21 = vector.shape_cast %20 : vector<1x128x128xf32> to vector<128x128xf32>
    %cst_28 = arith.constant dense<0.000000e+00> : vector<16x128xf32>
    %22 = tpu.matmul %19, %21, %cst_28 {dimension_numbers = #tpu.dot_dimension_numbers<[1], [0], [0], [1], [0, 0, 1, 1], [], []>} : vector<16x128xf32>, vector<128x128xf32>, vector<16x128xf32> -> vector<16x128xf32>
    %23 = arith.truncf %19 : vector<16x128xf32> to vector<16x128xbf16>
    %c1_29 = arith.constant 1 : index
    %c0_30 = arith.constant 0 : index
    %c0_31 = arith.constant 0 : index
    %24 = vector.load %arg3[%c1_29, %c0_30, %c0_31] : memref<3x128x128xbf16, #tpu.memory_space<vmem>>, vector<1x128x128xbf16>
    %25 = vector.shape_cast %24 : vector<1x128x128xbf16> to vector<128x128xbf16>
    %cst_32 = arith.constant dense<0.000000e+00> : vector<16x128xf32>
    %26 = tpu.matmul %23, %25, %cst_32 {dimension_numbers = #tpu.dot_dimension_numbers<[1], [0], [0], [1], [0, 0, 1, 1], [], []>} : vector<16x128xbf16>, vector<128x128xbf16>, vector<16x128xf32> -> vector<16x128xf32>
    %27 = arith.addf %14, %22 : vector<16x128xf32>
    %28 = arith.addf %18, %26 : vector<16x128xf32>
    %c2 = arith.constant 2 : index
    %c0_33 = arith.constant 0 : index
    %29 = vector.load %arg11[%c2, %c0_33] : memref<18x128xf32, #tpu.memory_space<vmem>>, vector<16x128xf32>
    %c2_34 = arith.constant 2 : index
    %c0_35 = arith.constant 0 : index
    %c0_36 = arith.constant 0 : index
    %30 = vector.load %arg2[%c2_34, %c0_35, %c0_36] : memref<3x128x128xf32, #tpu.memory_space<vmem>>, vector<1x128x128xf32>
    %31 = vector.shape_cast %30 : vector<1x128x128xf32> to vector<128x128xf32>
    %cst_37 = arith.constant dense<0.000000e+00> : vector<16x128xf32>
    %32 = tpu.matmul %29, %31, %cst_37 {dimension_numbers = #tpu.dot_dimension_numbers<[1], [0], [0], [1], [0, 0, 1, 1], [], []>} : vector<16x128xf32>, vector<128x128xf32>, vector<16x128xf32> -> vector<16x128xf32>
    %33 = arith.truncf %29 : vector<16x128xf32> to vector<16x128xbf16>
    %c2_38 = arith.constant 2 : index
    %c0_39 = arith.constant 0 : index
    %c0_40 = arith.constant 0 : index
    %34 = vector.load %arg3[%c2_38, %c0_39, %c0_40] : memref<3x128x128xbf16, #tpu.memory_space<vmem>>, vector<1x128x128xbf16>
    %35 = vector.shape_cast %34 : vector<1x128x128xbf16> to vector<128x128xbf16>
    %cst_41 = arith.constant dense<0.000000e+00> : vector<16x128xf32>
    %36 = tpu.matmul %33, %35, %cst_41 {dimension_numbers = #tpu.dot_dimension_numbers<[1], [0], [0], [1], [0, 0, 1, 1], [], []>} : vector<16x128xbf16>, vector<128x128xbf16>, vector<16x128xf32> -> vector<16x128xf32>
    %37 = arith.addf %27, %32 : vector<16x128xf32>
    %38 = arith.addf %28, %36 : vector<16x128xf32>
    %c0_42 = arith.constant 0 : index
    %c0_43 = arith.constant 0 : index
    %39 = vector.load %arg5[%c0_42, %c0_43] : memref<3x128xf32, #tpu.memory_space<vmem>>, vector<1x128xf32>
    %40 = vector.broadcast %39 : vector<1x128xf32> to vector<16x128xf32>
    %41 = arith.addf %37, %40 : vector<16x128xf32>
    %cst_44 = arith.constant 0.000000e+00 : f32
    %42 = vector.broadcast %cst_44 : f32 to vector<16x128xf32>
    %43 = arith.cmpf ogt, %41, %42 : vector<16x128xf32>
    %cst_45 = arith.constant 1.000000e+00 : f32
    %cst_46 = arith.constant -1.000000e+00 : f32
    %44 = vector.broadcast %cst_45 : f32 to vector<16x128xf32>
    %45 = vector.broadcast %cst_46 : f32 to vector<16x128xf32>
    %46 = arith.select %43, %44, %45 : vector<16x128xi1>, vector<16x128xf32>
    %47 = arith.truncf %46 : vector<16x128xf32> to vector<16x128xbf16>
    %c1_47 = arith.constant 1 : index
    %c0_48 = arith.constant 0 : index
    %48 = vector.load %arg12[%c1_47, %c0_48] : memref<18x128xbf16, #tpu.memory_space<vmem>>, vector<16x128xbf16>
    tpu.vector_store %arg12[%c1_47, %c0_48], %47 {strides = array<i32>} : memref<18x128xbf16, #tpu.memory_space<vmem>>, vector<16x128xbf16>,
    %c0_49 = arith.constant 0 : index
    %c0_50 = arith.constant 0 : index
    %49 = vector.load %arg12[%c0_49, %c0_50] : memref<18x128xbf16, #tpu.memory_space<vmem>>, vector<16x128xbf16>
    %c0_51 = arith.constant 0 : index
    %c0_52 = arith.constant 0 : index
    %c0_53 = arith.constant 0 : index
    %50 = vector.load %arg4[%c0_51, %c0_52, %c0_53] : memref<3x128x128xbf16, #tpu.memory_space<vmem>>, vector<1x128x128xbf16>
    %51 = vector.shape_cast %50 : vector<1x128x128xbf16> to vector<128x128xbf16>
    %cst_54 = arith.constant dense<0.000000e+00> : vector<16x128xf32>
    %52 = tpu.matmul %49, %51, %cst_54 {dimension_numbers = #tpu.dot_dimension_numbers<[1], [0], [0], [1], [0, 0, 1, 1], [], []>} : vector<16x128xbf16>, vector<128x128xbf16>, vector<16x128xf32> -> vector<16x128xf32>
    %53 = arith.addf %38, %52 : vector<16x128xf32>
    %c1_55 = arith.constant 1 : index
    %c0_56 = arith.constant 0 : index
    %54 = vector.load %arg12[%c1_55, %c0_56] : memref<18x128xbf16, #tpu.memory_space<vmem>>, vector<16x128xbf16>
    %c1_57 = arith.constant 1 : index
    %c0_58 = arith.constant 0 : index
    %c0_59 = arith.constant 0 : index
    %55 = vector.load %arg4[%c1_57, %c0_58, %c0_59] : memref<3x128x128xbf16, #tpu.memory_space<vmem>>, vector<1x128x128xbf16>
    %56 = vector.shape_cast %55 : vector<1x128x128xbf16> to vector<128x128xbf16>
    %cst_60 = arith.constant dense<0.000000e+00> : vector<16x128xf32>
    %57 = tpu.matmul %54, %56, %cst_60 {dimension_numbers = #tpu.dot_dimension_numbers<[1], [0], [0], [1], [0, 0, 1, 1], [], []>} : vector<16x128xbf16>, vector<128x128xbf16>, vector<16x128xf32> -> vector<16x128xf32>
    %58 = arith.addf %53, %57 : vector<16x128xf32>
    %c2_61 = arith.constant 2 : index
    %c0_62 = arith.constant 0 : index
    %59 = vector.load %arg12[%c2_61, %c0_62] : memref<18x128xbf16, #tpu.memory_space<vmem>>, vector<16x128xbf16>
    %c2_63 = arith.constant 2 : index
    %c0_64 = arith.constant 0 : index
    %c0_65 = arith.constant 0 : index
    %60 = vector.load %arg4[%c2_63, %c0_64, %c0_65] : memref<3x128x128xbf16, #tpu.memory_space<vmem>>, vector<1x128x128xbf16>
    %61 = vector.shape_cast %60 : vector<1x128x128xbf16> to vector<128x128xbf16>
    %cst_66 = arith.constant dense<0.000000e+00> : vector<16x128xf32>
    %62 = tpu.matmul %59, %61, %cst_66 {dimension_numbers = #tpu.dot_dimension_numbers<[1], [0], [0], [1], [0, 0, 1, 1], [], []>} : vector<16x128xbf16>, vector<128x128xbf16>, vector<16x128xf32> -> vector<16x128xf32>
    %63 = arith.addf %58, %62 : vector<16x128xf32>
    %c1_67 = arith.constant 1 : index
    %c0_68 = arith.constant 0 : index
    %64 = vector.load %arg5[%c1_67, %c0_68] : memref<3x128xf32, #tpu.memory_space<vmem>>, vector<1x128xf32>
    %65 = vector.broadcast %64 : vector<1x128xf32> to vector<16x128xf32>
    %66 = arith.addf %63, %65 : vector<16x128xf32>
    %cst_69 = arith.constant 0.000000e+00 : f32
    %67 = vector.broadcast %cst_69 : f32 to vector<16x128xf32>
    %68 = arith.cmpf oge, %66, %67 : vector<16x128xf32>
    %c2_70 = arith.constant 2 : index
    %c0_71 = arith.constant 0 : index
    %69 = vector.load %arg5[%c2_70, %c0_71] : memref<3x128xf32, #tpu.memory_space<vmem>>, vector<1x128xf32>
    %70 = vector.broadcast %69 : vector<1x128xf32> to vector<16x128xf32>
    %71 = arith.mulf %70, %66 : vector<16x128xf32>
    %72 = arith.select %68, %66, %71 : vector<16x128xi1>, vector<16x128xf32>
    %73 = arith.addf %72, %9 : vector<16x128xf32>
    %c1_72 = arith.constant 1 : index
    %c0_73 = arith.constant 0 : index
    %74 = vector.load %arg11[%c1_72, %c0_73] : memref<18x128xf32, #tpu.memory_space<vmem>>, vector<16x128xf32>
    tpu.vector_store %arg11[%c1_72, %c0_73], %73 {strides = array<i32>} : memref<18x128xf32, #tpu.memory_space<vmem>>, vector<16x128xf32>,
    %c0_74 = arith.constant 0 : index
    %c0_75 = arith.constant 0 : index
    %75 = vector.load %arg11[%c0_74, %c0_75] : memref<18x128xf32, #tpu.memory_space<vmem>>, vector<16x128xf32>
    %c0_76 = arith.constant 0 : index
    %c0_77 = arith.constant 0 : index
    %c0_78 = arith.constant 0 : index
    %76 = vector.load %arg6[%c0_76, %c0_77, %c0_78] : memref<3x128x128xf32, #tpu.memory_space<vmem>>, vector<1x128x128xf32>
    %77 = vector.shape_cast %76 : vector<1x128x128xf32> to vector<128x128xf32>
    %cst_79 = arith.constant dense<0.000000e+00> : vector<16x128xf32>
    %78 = tpu.matmul %75, %77, %cst_79 {dimension_numbers = #tpu.dot_dimension_numbers<[1], [0], [0], [1], [0, 0, 1, 1], [], []>} : vector<16x128xf32>, vector<128x128xf32>, vector<16x128xf32> -> vector<16x128xf32>
    %79 = arith.truncf %75 : vector<16x128xf32> to vector<16x128xbf16>
    %c0_80 = arith.constant 0 : index
    %c0_81 = arith.constant 0 : index
    %c0_82 = arith.constant 0 : index
    %80 = vector.load %arg7[%c0_80, %c0_81, %c0_82] : memref<3x128x128xbf16, #tpu.memory_space<vmem>>, vector<1x128x128xbf16>
    %81 = vector.shape_cast %80 : vector<1x128x128xbf16> to vector<128x128xbf16>
    %cst_83 = arith.constant dense<0.000000e+00> : vector<16x128xf32>
    %82 = tpu.matmul %79, %81, %cst_83 {dimension_numbers = #tpu.dot_dimension_numbers<[1], [0], [0], [1], [0, 0, 1, 1], [], []>} : vector<16x128xbf16>, vector<128x128xbf16>, vector<16x128xf32> -> vector<16x128xf32>
    %c1_84 = arith.constant 1 : index
    %c0_85 = arith.constant 0 : index
    %83 = vector.load %arg11[%c1_84, %c0_85] : memref<18x128xf32, #tpu.memory_space<vmem>>, vector<16x128xf32>
    %c1_86 = arith.constant 1 : index
    %c0_87 = arith.constant 0 : index
    %c0_88 = arith.constant 0 : index
    %84 = vector.load %arg6[%c1_86, %c0_87, %c0_88] : memref<3x128x128xf32, #tpu.memory_space<vmem>>, vector<1x128x128xf32>
    %85 = vector.shape_cast %84 : vector<1x128x128xf32> to vector<128x128xf32>
    %cst_89 = arith.constant dense<0.000000e+00> : vector<16x128xf32>
    %86 = tpu.matmul %83, %85, %cst_89 {dimension_numbers = #tpu.dot_dimension_numbers<[1], [0], [0], [1], [0, 0, 1, 1], [], []>} : vector<16x128xf32>, vector<128x128xf32>, vector<16x128xf32> -> vector<16x128xf32>
    %87 = arith.truncf %83 : vector<16x128xf32> to vector<16x128xbf16>
    %c1_90 = arith.constant 1 : index
    %c0_91 = arith.constant 0 : index
    %c0_92 = arith.constant 0 : index
    %88 = vector.load %arg7[%c1_90, %c0_91, %c0_92] : memref<3x128x128xbf16, #tpu.memory_space<vmem>>, vector<1x128x128xbf16>
    %89 = vector.shape_cast %88 : vector<1x128x128xbf16> to vector<128x128xbf16>
    %cst_93 = arith.constant dense<0.000000e+00> : vector<16x128xf32>
    %90 = tpu.matmul %87, %89, %cst_93 {dimension_numbers = #tpu.dot_dimension_numbers<[1], [0], [0], [1], [0, 0, 1, 1], [], []>} : vector<16x128xbf16>, vector<128x128xbf16>, vector<16x128xf32> -> vector<16x128xf32>
    %91 = arith.addf %78, %86 : vector<16x128xf32>
    %92 = arith.addf %82, %90 : vector<16x128xf32>
    %c2_94 = arith.constant 2 : index
    %c0_95 = arith.constant 0 : index
    %93 = vector.load %arg11[%c2_94, %c0_95] : memref<18x128xf32, #tpu.memory_space<vmem>>, vector<16x128xf32>
    %c2_96 = arith.constant 2 : index
    %c0_97 = arith.constant 0 : index
    %c0_98 = arith.constant 0 : index
    %94 = vector.load %arg6[%c2_96, %c0_97, %c0_98] : memref<3x128x128xf32, #tpu.memory_space<vmem>>, vector<1x128x128xf32>
    %95 = vector.shape_cast %94 : vector<1x128x128xf32> to vector<128x128xf32>
    %cst_99 = arith.constant dense<0.000000e+00> : vector<16x128xf32>
    %96 = tpu.matmul %93, %95, %cst_99 {dimension_numbers = #tpu.dot_dimension_numbers<[1], [0], [0], [1], [0, 0, 1, 1], [], []>} : vector<16x128xf32>, vector<128x128xf32>, vector<16x128xf32> -> vector<16x128xf32>
    %97 = arith.truncf %93 : vector<16x128xf32> to vector<16x128xbf16>
    %c2_100 = arith.constant 2 : index
    %c0_101 = arith.constant 0 : index
    %c0_102 = arith.constant 0 : index
    %98 = vector.load %arg7[%c2_100, %c0_101, %c0_102] : memref<3x128x128xbf16, #tpu.memory_space<vmem>>, vector<1x128x128xbf16>
    %99 = vector.shape_cast %98 : vector<1x128x128xbf16> to vector<128x128xbf16>
    %cst_103 = arith.constant dense<0.000000e+00> : vector<16x128xf32>
    %100 = tpu.matmul %97, %99, %cst_103 {dimension_numbers = #tpu.dot_dimension_numbers<[1], [0], [0], [1], [0, 0, 1, 1], [], []>} : vector<16x128xbf16>, vector<128x128xbf16>, vector<16x128xf32> -> vector<16x128xf32>
    %101 = arith.addf %91, %96 : vector<16x128xf32>
    %102 = arith.addf %92, %100 : vector<16x128xf32>
    %c0_104 = arith.constant 0 : index
    %c0_105 = arith.constant 0 : index
    %103 = vector.load %arg9[%c0_104, %c0_105] : memref<3x128xf32, #tpu.memory_space<vmem>>, vector<1x128xf32>
    %104 = vector.broadcast %103 : vector<1x128xf32> to vector<16x128xf32>
    %105 = arith.addf %101, %104 : vector<16x128xf32>
    %cst_106 = arith.constant 0.000000e+00 : f32
    %106 = vector.broadcast %cst_106 : f32 to vector<16x128xf32>
    %107 = arith.cmpf ogt, %105, %106 : vector<16x128xf32>
    %cst_107 = arith.constant 1.000000e+00 : f32
    %cst_108 = arith.constant -1.000000e+00 : f32
    %108 = vector.broadcast %cst_107 : f32 to vector<16x128xf32>
    %109 = vector.broadcast %cst_108 : f32 to vector<16x128xf32>
    %110 = arith.select %107, %108, %109 : vector<16x128xi1>, vector<16x128xf32>
    %111 = arith.truncf %110 : vector<16x128xf32> to vector<16x128xbf16>
    %c1_109 = arith.constant 1 : index
    %c0_110 = arith.constant 0 : index
    %112 = vector.load %arg12[%c1_109, %c0_110] : memref<18x128xbf16, #tpu.memory_space<vmem>>, vector<16x128xbf16>
    tpu.vector_store %arg12[%c1_109, %c0_110], %111 {strides = array<i32>} : memref<18x128xbf16, #tpu.memory_space<vmem>>, vector<16x128xbf16>,
    %c0_111 = arith.constant 0 : index
    %c0_112 = arith.constant 0 : index
    %113 = vector.load %arg12[%c0_111, %c0_112] : memref<18x128xbf16, #tpu.memory_space<vmem>>, vector<16x128xbf16>
    %c0_113 = arith.constant 0 : index
    %c0_114 = arith.constant 0 : index
    %c0_115 = arith.constant 0 : index
    %114 = vector.load %arg8[%c0_113, %c0_114, %c0_115] : memref<3x128x128xbf16, #tpu.memory_space<vmem>>, vector<1x128x128xbf16>
    %115 = vector.shape_cast %114 : vector<1x128x128xbf16> to vector<128x128xbf16>
    %cst_116 = arith.constant dense<0.000000e+00> : vector<16x128xf32>
    %116 = tpu.matmul %113, %115, %cst_116 {dimension_numbers = #tpu.dot_dimension_numbers<[1], [0], [0], [1], [0, 0, 1, 1], [], []>} : vector<16x128xbf16>, vector<128x128xbf16>, vector<16x128xf32> -> vector<16x128xf32>
    %117 = arith.addf %102, %116 : vector<16x128xf32>
    %c1_117 = arith.constant 1 : index
    %c0_118 = arith.constant 0 : index
    %118 = vector.load %arg12[%c1_117, %c0_118] : memref<18x128xbf16, #tpu.memory_space<vmem>>, vector<16x128xbf16>
    %c1_119 = arith.constant 1 : index
    %c0_120 = arith.constant 0 : index
    %c0_121 = arith.constant 0 : index
    %119 = vector.load %arg8[%c1_119, %c0_120, %c0_121] : memref<3x128x128xbf16, #tpu.memory_space<vmem>>, vector<1x128x128xbf16>
    %120 = vector.shape_cast %119 : vector<1x128x128xbf16> to vector<128x128xbf16>
    %cst_122 = arith.constant dense<0.000000e+00> : vector<16x128xf32>
    %121 = tpu.matmul %118, %120, %cst_122 {dimension_numbers = #tpu.dot_dimension_numbers<[1], [0], [0], [1], [0, 0, 1, 1], [], []>} : vector<16x128xbf16>, vector<128x128xbf16>, vector<16x128xf32> -> vector<16x128xf32>
    %122 = arith.addf %117, %121 : vector<16x128xf32>
    %c2_123 = arith.constant 2 : index
    %c0_124 = arith.constant 0 : index
    %123 = vector.load %arg12[%c2_123, %c0_124] : memref<18x128xbf16, #tpu.memory_space<vmem>>, vector<16x128xbf16>
    %c2_125 = arith.constant 2 : index
    %c0_126 = arith.constant 0 : index
    %c0_127 = arith.constant 0 : index
    %124 = vector.load %arg8[%c2_125, %c0_126, %c0_127] : memref<3x128x128xbf16, #tpu.memory_space<vmem>>, vector<1x128x128xbf16>
    %125 = vector.shape_cast %124 : vector<1x128x128xbf16> to vector<128x128xbf16>
    %cst_128 = arith.constant dense<0.000000e+00> : vector<16x128xf32>
    %126 = tpu.matmul %123, %125, %cst_128 {dimension_numbers = #tpu.dot_dimension_numbers<[1], [0], [0], [1], [0, 0, 1, 1], [], []>} : vector<16x128xbf16>, vector<128x128xbf16>, vector<16x128xf32> -> vector<16x128xf32>
    %127 = arith.addf %122, %126 : vector<16x128xf32>
    %c1_129 = arith.constant 1 : index
    %c0_130 = arith.constant 0 : index
    %128 = vector.load %arg9[%c1_129, %c0_130] : memref<3x128xf32, #tpu.memory_space<vmem>>, vector<1x128xf32>
    %129 = vector.broadcast %128 : vector<1x128xf32> to vector<16x128xf32>
    %130 = arith.addf %127, %129 : vector<16x128xf32>
    %cst_131 = arith.constant 0.000000e+00 : f32
    %131 = vector.broadcast %cst_131 : f32 to vector<16x128xf32>
    %132 = arith.cmpf oge, %130, %131 : vector<16x128xf32>
    %c2_132 = arith.constant 2 : index
    %c0_133 = arith.constant 0 : index
    %133 = vector.load %arg9[%c2_132, %c0_133] : memref<3x128xf32, #tpu.memory_space<vmem>>, vector<1x128xf32>
    %134 = vector.broadcast %133 : vector<1x128xf32> to vector<16x128xf32>
    %135 = arith.mulf %134, %130 : vector<16x128xf32>
    %136 = arith.select %132, %130, %135 : vector<16x128xi1>, vector<16x128xf32>
    %137 = arith.addf %136, %73 : vector<16x128xf32>
    %c0_134 = arith.constant 0 : index
    %c0_135 = arith.constant 0 : index
    %c0_136 = arith.constant 0 : index
    %138 = vector.load %arg10[%c0_134, %c0_135, %c0_136] : memref<1x16x128xf32, #tpu.memory_space<vmem>>, vector<1x16x128xf32>
    %139 = vector.shape_cast %138 : vector<1x16x128xf32> to vector<16x128xf32>
    %140 = vector.shape_cast %137 : vector<16x128xf32> to vector<1x16x128xf32>
    tpu.vector_store %arg10[%c0_134, %c0_135, %c0_136], %140 {strides = array<i32>} : memref<1x16x128xf32, #tpu.memory_space<vmem>>, vector<1x16x128xf32>,
    return
  }
  func.func @transform_0(%arg0: i32) -> (i32, i32, i32) {
    %c0_i32 = arith.constant 0 : i32
    %c0_i32_0 = arith.constant 0 : i32
    %c0_i32_1 = arith.constant 0 : i32
    return %arg0, %c0_i32, %c0_i32_0 : i32, i32, i32
  }
  func.func @transform_1(%arg0: i32) -> (i32, i32, i32) {
    %c0_i32 = arith.constant 0 : i32
    %c0_i32_0 = arith.constant 0 : i32
    %c0_i32_1 = arith.constant 0 : i32
    %c0_i32_2 = arith.constant 0 : i32
    return %c0_i32, %c0_i32_0, %c0_i32_1 : i32, i32, i32
  }
  func.func @transform_2(%arg0: i32) -> (i32, i32, i32) {
    %c0_i32 = arith.constant 0 : i32
    %c0_i32_0 = arith.constant 0 : i32
    %c0_i32_1 = arith.constant 0 : i32
    %c0_i32_2 = arith.constant 0 : i32
    return %c0_i32, %c0_i32_0, %c0_i32_1 : i32, i32, i32
  }
  func.func @transform_3(%arg0: i32) -> (i32, i32, i32) {
    %c0_i32 = arith.constant 0 : i32
    %c0_i32_0 = arith.constant 0 : i32
    %c0_i32_1 = arith.constant 0 : i32
    %c0_i32_2 = arith.constant 0 : i32
    return %c0_i32, %c0_i32_0, %c0_i32_1 : i32, i32, i32
  }
  func.func @transform_4(%arg0: i32) -> (i32, i32) {
    %c0_i32 = arith.constant 0 : i32
    %c0_i32_0 = arith.constant 0 : i32
    %c0_i32_1 = arith.constant 0 : i32
    return %c0_i32, %c0_i32_0 : i32, i32
  }
  func.func @transform_5(%arg0: i32) -> (i32, i32, i32) {
    %c0_i32 = arith.constant 0 : i32
    %c0_i32_0 = arith.constant 0 : i32
    %c0_i32_1 = arith.constant 0 : i32
    %c0_i32_2 = arith.constant 0 : i32
    return %c0_i32, %c0_i32_0, %c0_i32_1 : i32, i32, i32
  }
  func.func @transform_6(%arg0: i32) -> (i32, i32, i32) {
    %c0_i32 = arith.constant 0 : i32
    %c0_i32_0 = arith.constant 0 : i32
    %c0_i32_1 = arith.constant 0 : i32
    %c0_i32_2 = arith.constant 0 : i32
    return %c0_i32, %c0_i32_0, %c0_i32_1 : i32, i32, i32
  }
  func.func @transform_7(%arg0: i32) -> (i32, i32, i32) {
    %c0_i32 = arith.constant 0 : i32
    %c0_i32_0 = arith.constant 0 : i32
    %c0_i32_1 = arith.constant 0 : i32
    %c0_i32_2 = arith.constant 0 : i32
    return %c0_i32, %c0_i32_0, %c0_i32_1 : i32, i32, i32
  }
  func.func @transform_8(%arg0: i32) -> (i32, i32) {
    %c0_i32 = arith.constant 0 : i32
    %c0_i32_0 = arith.constant 0 : i32
    %c0_i32_1 = arith.constant 0 : i32
    return %c0_i32, %c0_i32_0 : i32, i32
  }
  func.func @transform_9(%arg0: i32) -> (i32, i32, i32) {
    %c0_i32 = arith.constant 0 : i32
    %c0_i32_0 = arith.constant 0 : i32
    %c0_i32_1 = arith.constant 0 : i32
    return %arg0, %c0_i32, %c0_i32_0 : i32, i32, i32
  }
}

</mosaic_0001>

<bundles_post_ra>
// kernel: tpu_custom_call.1
= control target key start
LH: loop header
LB: loop body
LE: loop exit
PB: predicated region body
PF: predicated region fallthrough
CT: control target
= control target key end

     0   :  { %s3410_s0 = inlined_call_operand.hbm [shape: f32[2,16,128], index: 0, kind: input, shape index: {}]   ;;  %s3411_s1 = inlined_call_operand.hbm [shape: f32[3,128,128], index: 1, kind: input, shape index: {}]   ;;  %s3412_s2 = inlined_call_operand.hbm [shape: bf16[3,128,128], index: 2, kind: input, shape index: {}]   ;;  %s3413_s3 = inlined_call_operand.hbm [shape: bf16[3,128,128], index: 3, kind: input, shape index: {}]   ;;  %s3414_s4 = inlined_call_operand.hbm [shape: f32[3,128], index: 4, kind: input, shape index: {}]   ;;  %s3415_s5 = inlined_call_operand.hbm [shape: f32[3,128,128], index: 5, kind: input, shape index: {}]   ;;  %s3416_s6 = inlined_call_operand.hbm [shape: bf16[3,128,128], index: 6, kind: input, shape index: {}]   ;;  %s3417_s7 = inlined_call_operand.hbm [shape: bf16[3,128,128], index: 7, kind: input, shape index: {}]   ;;  %s3418_s8 = inlined_call_operand.vmem [shape: f32[3,128], index: 8, kind: input, shape index: {}]   ;;  %s3419_s9 = inlined_call_operand.hbm [shape: f32[2,16,128], index: 9, kind: output, shape index: {}]  }
   0x1   :  { %3422 = sst [smem:[#allocation25_spill]] %s3411_s1 }
   0x2   :  { %3423 = sst [smem:[#allocation26_spill]] %s3412_s2 }
   0x3   :  { %3424 = sst [smem:[#allocation27_spill]] %s3413_s3 }
   0x4   :  { %14 = vsyncpa [#allocation5], 0 }
   0x5   :  { %16 = vsyncpa [#allocation5 + $0x1], 0 }
   0x6   :  { %17 = vsyncpa [#allocation8], 0 }
   0x7   :  { %18 = vsyncpa [#allocation11], 0 }
   0x8   :  { %19 = vsyncpa [#allocation14], 0 }
   0x9   :  { %20 = vsyncpa [#allocation17], 0 }
   0xa   :  { %21 = vsyncpa [#allocation6], 0 }
   0xb   :  { %23 = vsyncpa [#allocation6 + $0x1], 0  ;;  %s3107_s30 = smov 0   ;;  %s3109_s10 = smov 0  }
   0xc   :  { %s3111_s11 = smov 0   ;;  %s3113_s12 = smov 0  }
   0xd LB: > { %s3425_s1 = sld [smem:[#allocation25_spill]]  ;;  %s3131_s16 = sadd.s32 4294967295, %s3040_s12   ;;  %s3040_s12 = sphi %s3113_s12, %s3446_s12   ;;  %s3036_s11 = sphi %s3111_s11, %s3445_s11   ;;  %s3032_s10 = sphi %s3109_s10, %s3444_s10   ;;  %s3028_s30 = sphi %s3107_s30, %s3443_s30  }
   0xe   : > { %p2054_p0 = scmp.ge.s32.totalorder %s3040_s12, 1  ;;  %p50_p1 = scmp.eq.s32.totalorder %s3131_s16, 0 }
   0xf   : > { %p254_p2 = scmp.lt.s32.totalorder %s3040_s12, 3  ;;  %s3042_s18 = smov [#allocation7]  }
  0x10   : > { %s267_s19 = sshll.u32 %s3042_s18, 4  ;;  %s3428_s3 = sld [smem:[#allocation27_spill]]  ;;  %s268_s19 = int_to_ptr.vmem [resolvable:$true] %s267_s19 }
  0x11   : > { %p3136_p3 = pnand %p2054_p0, %p254_p2  ;;  %s3420_s24 = smov 128  }
  0x12   : > { %s3421_s25 = smov 8   ;;  %s3045_s26 = smov [#allocation10]  }
  0x13   : > { %s265_s15 = sshll.u32 %s3425_s1, 4  ;;  %p2619_p4 = pneg %p3136_p3  ;;  %s266_s15 = int_to_ptr.hbm [resolvable:$true] %s265_s15 }
  0x14   : > { %s295_s27 = sshll.u32 %s3045_s26, 4  ;;  %s319_s13 = sshll.u32 %s3415_s5, 4  ;;  %s296_s27 = int_to_ptr.vmem [resolvable:$true] %s295_s27  ;;  %s320_s13 = int_to_ptr.hbm [resolvable:$true] %s319_s13 }
  0x15   : > { %p3145_p6 = pnand %p2619_p4, %p50_p1  ;;  %s3046_s14 = smov 64  }
  0x16   : > { %s293_s23 = sshll.u32 %s3428_s3, 4  ;;  %s3047_s18 = smov 4   ;;  %s294_s23 = int_to_ptr.hbm [resolvable:$true] %s293_s23 }
  0x17   : > { %2622 = dma.hbm_to_vmem [thread:$0]  (!%p3145_p6), %s266_s15, 6144, %s268_s19, [#allocation8], %s3420_s24, %s3420_s24, %s3421_s25  }
  0x18   : > { %2628 = dma.hbm_to_vmem [thread:$0]  (!%p3145_p6), %s294_s23, 3072, %s296_s27, [#allocation11], %s3046_s14, %s3046_s14, %s3047_s18  }
  0x19   : > { %s3429_s2 = sld [smem:[#allocation26_spill]]  ;;  %s3048_s19 = smov [#allocation13]  }
  0x1a   : > { %s321_s26 = sshll.u32 %s3048_s19, 4  ;;  %s3049_s28 = smov [#allocation9]   ;;  %s322_s26 = int_to_ptr.vmem [resolvable:$true] %s321_s26 }
  0x1b   : > { %2634 = dma.hbm_to_vmem [thread:$0]  (!%p3145_p6), %s320_s13, 6144, %s322_s26, [#allocation14], %s3420_s24, %s3420_s24, %s3421_s25  }
  0x1c   : > { %s281_s29 = sshll.u32 %s3049_s28, 4  ;;  %s308_s23 = sshll.u32 %s3414_s4, 4  ;;  %s282_s29 = int_to_ptr.vmem [resolvable:$true] %s281_s29  ;;  %s309_s23 = int_to_ptr.hbm [resolvable:$true] %s308_s23 }
  0x1d   : > { %s333_s22 = sshll.u32 %s3416_s6, 4  ;;  %s3050_s13 = smov [#allocation12]   ;;  %s334_s22 = int_to_ptr.hbm [resolvable:$true] %s333_s22 }
  0x1e   : > { %s310_s19 = sshll.u32 %s3050_s13, 4  ;;  %s3051_s1 = smov [#allocation15]   ;;  %s311_s19 = int_to_ptr.vmem [resolvable:$true] %s310_s19 }
  0x1f   : > { %s279_s15 = sshll.u32 %s3429_s2, 4  ;;  %s335_s3 = sshll.u32 %s3051_s1, 4  ;;  %s280_s15 = int_to_ptr.hbm [resolvable:$true] %s279_s15  ;;  %s336_s3 = int_to_ptr.vmem [resolvable:$true] %s335_s3 }
  0x20   : > { %2625 = dma.hbm_to_vmem [thread:$0]  (!%p3145_p6), %s280_s15, 3072, %s282_s29, [#allocation8], %s3046_s14, %s3046_s14, %s3047_s18  }
  0x21   : > { %2631 = dma.hbm_to_vmem [thread:$0]  (!%p3145_p6), %s309_s23, 64, %s311_s19, [#allocation11]  }
  0x22   : > { %s347_s28 = sshll.u32 %s3417_s7, 4  ;;  %s3052_s29 = smov [#allocation16]   ;;  %s348_s28 = int_to_ptr.hbm [resolvable:$true] %s347_s28 }
  0x23   : > { %2637 = dma.hbm_to_vmem [thread:$0]  (!%p3145_p6), %s334_s22, 3072, %s336_s3, [#allocation14], %s3046_s14, %s3046_s14, %s3047_s18  }
  0x24   : > { %s349_s23 = sshll.u32 %s3052_s29, 4  ;;  %s2053_s27 = sadd.s32 4294967294, %s3040_s12   ;;  %s350_s23 = int_to_ptr.vmem [resolvable:$true] %s349_s23 }
  0x25   : > { %2640 = dma.hbm_to_vmem [thread:$0]  (!%p3145_p6), %s348_s28, 3072, %s350_s23, [#allocation17], %s3046_s14, %s3046_s14, %s3047_s18  }
  0x26   : > { %s3201_s21 = sadd.s32 1, %s3040_s12   ;;  %s36_s13 = sadd.s32 1, %s3036_s11 }
  0x27   : > { %s33_s19 = ssub.s32 %s3040_s12, %s3201_s21  ;;  %p43_p7 = scmp.ne.s32.totalorder %s3036_s11, %s3032_s10 }
  0x28   : > { %p34_p8 = scmp.eq.s32.totalorder %s33_s19, 0  ;;  %p44_p9 = scmp.eq.s32.totalorder %s3040_s12, 0 }
  0x29   : > { %p49_p10 = scmp.ne.s32.totalorder %s3032_s10, %s3028_s30  ;;  %p241_p11 = scmp.eq.s32.totalorder %s3131_s16, 1 }
  0x2a   : > { %s3213_s22 = scalar_select %p34_p8, %s3036_s11, %s36_s13  }
  0x2b   : > { %p3217_p12 = por %p50_p1, %p49_p10  ;;  %p3221_p13 = por %p241_p11, %p43_p7 }
  0x2c   : > { %p247_p0 = scmp.eq.s32.totalorder %s2053_s27, 1  ;;  %p45_p2 = por %p44_p9, %p43_p7 }
  0x2d   : > { %s366_s18 = sand.u32 1, %s3036_s11   ;;  %p2656_p6 = scmp.lt.s32.totalorder %s3040_s12, 2 }
  0x2e   : > { %p3226_p4 = por %p247_p0, %p49_p10  ;;  %s2063_s3 = sshll.u32 %s366_s18, 4 }
  0x2f   : > { %s2473_s15 = sshll.u32 %s3040_s12, 4  ;;  %s370_s13 = scalar_lea.vmem [#allocation4], %s2063_s3 }
  0x30   : > { %s375_s29 = scalar_lea.hbm %s3410_s0, %s2473_s15  ;;  %s378_s19 = sshll.u32 %s370_s13, 4  ;;  %s379_s19 = int_to_ptr.vmem [resolvable:$true] %s378_s19 }
  0x31   : > { %s376_s23 = sshll.u32 %s375_s29, 4  ;;  %p3235_p8 = pnand %p2656_p6, %p45_p2  ;;  %s377_s23 = int_to_ptr.hbm [resolvable:$true] %s376_s23 }
  0x32   : > { %s367_s24 = scalar_lea.sflag [#allocation5], %s366_s18  ;;  %s2928_s25 = sshra.s32 %s377_s23, 4  ;;  %s2929_s25 = int_to_ptr.hbm [resolvable:$true] %s2928_s25 }
  0x33   : > { %s2930_s2 = scalar_lea.hbm %s2929_s25, 16  ;;  %p2932_p9 = pneg %p3235_p8 }
  0x34   : > { %p2931_p7 = scmp.ne.s32.totalorder %s2929_s25, %s2930_s2  ;;  %s2935_s3 = scalar_lea.hbm %s3410_s0, 32 }
  0x35   : > { %p2936_p0 = scmp.lt.s32.totalorder %s2929_s25, %s3410_s0  ;;  %p2937_p2 = scmp.lt.s32.totalorder %s2935_s3, %s2930_s2 }
  0x36   : > { %p2933_p10 = pnand %p2932_p9, %p2931_p7 }
  0x37   : > { %p2938_p6 = por %p2937_p2, %p2936_p0 }
  0x38   : > { %p2934_p11 = pneg %p2933_p10 }
  0x3a   : > { %p2939_p5 = pnand %p2938_p6, %p2934_p11 }
  0x3c   : > { %2942 = shalt.err (!%p2939_p5)
}
  0x3d   : > { %s3434_s18 = smov 8   ;;  %s3435_s13 = smov 128  }
  0x3e   : > { %2644 = dma.hbm_to_vmem [thread:$0]  (!%p3235_p8), %s377_s23, 256, %s379_s19, %s367_s24, %s3435_s13, %s3435_s13, %s3434_s18  }
  0x3f   : > { %390 = sbr.rel (%p3136_p3) target bundleno = 784 (0x310), region = 56  ;;  %s3255_s15 = sand.u32 (!%p3136_p3), 1, %s3032_s10  }
  0x40   : > { %s2067_s2 = sshll.u32 (!%p3136_p3), %s3255_s15, 4  ;;  %s393_s25 = scalar_lea.sflag (!%p3136_p3), [#allocation5], %s3255_s15 }
  0x41   : > { %s3261_s26 = scalar_lea.vmem (!%p3136_p3), [#allocation4], %s2067_s2 }
  0x44   : > { %3003 = dma.done.wait (%p3217_p12), %s393_s25, 256  }
  0x45   : > { %3005 = vsyncadd (%p3217_p12), %s393_s25, 4294967040 }
  0x46   : > { %3007 = dma.done.wait (%p50_p1), [#allocation8], 9216  }
  0x47   : > { %3009 = vsyncadd (%p50_p1), [#allocation8], 4294958080 }
  0x48   : > { %3011 = dma.done.wait (%p50_p1), [#allocation11], 3136  }
  0x49   : > { %3013 = vsyncadd (%p50_p1), [#allocation11], 4294964160 }
  0x4a   : > { %3015 = dma.done.wait (%p50_p1), [#allocation14], 9216  }
  0x4b   : > { %3017 = vsyncadd (%p50_p1), [#allocation14], 4294958080 }
  0x4c   : > { %3019 = dma.done.wait (%p50_p1), [#allocation17], 3072  }
  0x4d   : > { %3021 = vsyncadd (%p50_p1), [#allocation17], 4294964224  ;;  %v538_v0 = vld [vmem:[#allocation7 + $0xf8] sm:$0xff]  ;;  %v537_v1 = vld [vmem:[#allocation7 + $0xf0] sm:$0xff]  ;;  %v3053_v3 = vmov 0.0   ;;  %vm470_vm0 = vcmask 1040384  }
  0x4e   : > { %539 = vmatpush.msra.mxu0 %v538_v0  ;;  %v502_v2 = vld [vmem:[#allocation7 + $0x78] sm:$0xff]  ;;  %468 = vst [vmem:[#allocation2] sm:$0x1] %v3053_v3  ;;  %v536_v4 = vld [vmem:[#allocation7 + $0xe8] sm:$0xff]  ;;  %v501_v5 = vld [vmem:[#allocation7 + $0x70] sm:$0xff]  ;;  %vm885_vm6 = vcmask 1043456  }
  0x4f   : > { %642 = vmatpush.msra.mxu2 %v502_v2  ;;  %469 = vst [vmem:[#allocation2 + $0x11] sm:$0x1] %v3053_v3  ;;  %v500_v6 = vld [vmem:[#allocation7 + $0x68] sm:$0xff]  ;;  %v535_v7 = vld [vmem:[#allocation7 + $0xe0] sm:$0xff]  ;;  %v534_v9 = vld [vmem:[#allocation7 + $0xd8] sm:$0xff]  ;;  %vm1109_vm11 = vcmask 1046528  }
  0x50   : > { %540 = vmatpush.msra.mxu0 %v537_v1  ;;  %v499_v8 = vld [vmem:[#allocation7 + $0x60] sm:$0xff]  ;;  %v498_v10 = vld [vmem:[#allocation7 + $0x58] sm:$0xff]  ;;  %v533_v11 = vld [vmem:[#allocation7 + $0xd0] sm:$0xff]  ;;  %vm471_vm1 = vsmask.f32 256  ;;  %s2572_s3 = sshll.u32 %s3131_s16, 4 }
  0x51   : > { %643 = vmatpush.msra.mxu2 %v501_v5  ;;  %v497_v12 = vld [vmem:[#allocation7 + $0x50] sm:$0xff]  ;;  %v532_v13 = vld [vmem:[#allocation7 + $0xc8] sm:$0xff]  ;;  %v531_v15 = vld [vmem:[#allocation7 + $0xc0] sm:$0xff]  ;;  %vm476_vm3 = vsmask.f32 7938  ;;  %s1909_s18 = scalar_lea.hbm %s3419_s9, %s2572_s3  ;;  %s466_s13 = scalar_lea.vmem [#allocation18], %s2067_s2 }
  0x52   : > { %541 = vmatpush.msra.mxu0 %v536_v4  ;;  %v496_v14 = vld [vmem:[#allocation7 + $0x48] sm:$0xff]  ;;  %v3284_v16 = vld [vmem:[%s3261_s26] sm:$0xff]  ;;  %v530_v17 = vld [vmem:[#allocation7 + $0xb8] sm:$0xff]  ;;  %vm863_vm9 = vsmask.f32 4368  ;;  %s1910_s25 = sshll.u32 %s466_s13, 4  ;;  %s1911_s25 = int_to_ptr.vmem [resolvable:$true] %s1910_s25 }
  0x53   : > { %644 = vmatpush.msra.mxu2 %v500_v6  ;;  %v495_v18 = vld [vmem:[#allocation7 + $0x40] sm:$0xff]  ;;  %483 = vst [vmem:[#allocation2 + $0x1] sm:$0xff] %v3284_v16  ;;  %v3288_v19 = vld [vmem:[%s3261_s26 + $0x8] sm:$0xff]  ;;  %v529_v21 = vld [vmem:[#allocation7 + $0xb0] sm:$0xff]  ;;  %vm1010_vm12 = vsmask.f32 7424 }
  0x54   : > { %542 = vmatpush.msra.mxu0 %v535_v7  ;;  %v494_v20 = vld [vmem:[#allocation7 + $0x38] sm:$0xff]  ;;  %484 = vst [vmem:[#allocation2 + $0x9] sm:$0xff] %v3288_v19  ;;  %v493_v22 = vld [vmem:[#allocation7 + $0x30] sm:$0xff]  ;;  %v528_v23 = vld [vmem:[#allocation7 + $0xa8] sm:$0xff]  ;;  %s1912_s26 = sshll.u32 %s1909_s18, 4  ;;  %s1898_s16 = scalar_lea.sflag [#allocation6], %s3255_s15  ;;  %s1913_s26 = int_to_ptr.hbm [resolvable:$true] %s1912_s26 }
  0x55   : > { %645 = vmatpush.msra.mxu2 %v499_v8  ;;  %v492_v24 = vld [vmem:[#allocation7 + $0x28] sm:$0xff]  ;;  %v527_v25 = vld [vmem:[#allocation7 + $0xa0] sm:$0xff]  ;;  %v526_v27 = vld [vmem:[#allocation7 + $0x98] sm:$0xff]  ;;  %s2972_s17 = sshra.s32 %s1913_s26, 4  ;;  %s2978_s23 = scalar_lea.hbm %s3419_s9, 32  ;;  %s2973_s17 = int_to_ptr.hbm [resolvable:$true] %s2972_s17 }
  0x56   : > { %543 = vmatpush.msra.mxu0 %v534_v9  ;;  %v491_v26 = vld [vmem:[#allocation7 + $0x20] sm:$0xff]  ;;  %v490_v28 = vld [vmem:[#allocation7 + $0x18] sm:$0xff]  ;;  %v525_v29 = vld [vmem:[#allocation7 + $0x90] sm:$0xff]  ;;  %s2974_s24 = scalar_lea.hbm %s2973_s17, 16  ;;  %p2979_p12 = scmp.lt.s32.totalorder %s2973_s17, %s3419_s9 }
  0x57   : > { %646 = vmatpush.msra.mxu2 %v498_v10  ;;  %v489_v30 = vld [vmem:[#allocation7 + $0x10] sm:$0xff]  ;;  %v524_v31 = vld [vmem:[#allocation7 + $0x88] sm:$0xff]  ;;  %v523_v33 = vld [vmem:[#allocation7 + $0x80] sm:$0xff]  ;;  %p2975_p1 = scmp.ne.s32.totalorder %s2973_s17, %s2974_s24  ;;  %p2980_p8 = scmp.lt.s32.totalorder %s2978_s23, %s2974_s24 }
  0x58   : > { %544 = vmatpush.msra.mxu0 %v533_v11  ;;  %v488_v32 = vld [vmem:[#allocation7 + $0x8] sm:$0xff]  ;;  %v745_v34 = vld [vmem:[#allocation7 + $0x178] sm:$0xff]  ;;  %v487_v35 = vld [vmem:[#allocation7] sm:$0xff] }
  0x59   : > { %647 = vmatpush.msra.mxu2 %v497_v12  ;;  %v744_v37 = vld [vmem:[#allocation7 + $0x170] sm:$0xff]  ;;  %v743_v38 = vld [vmem:[#allocation7 + $0x168] sm:$0xff]  ;;  %v742_v39 = vld [vmem:[#allocation7 + $0x160] sm:$0xff]  ;;  %p2976_p3 = pnand %p2975_p1, %p3221_p13  ;;  %p2981_p7 = por %p2980_p8, %p2979_p12 }
  0x5a   : > { %545 = vmatpush.msra.mxu0 %v532_v13  ;;  %v3291_v36 = vld [vmem:[#allocation2] sm:$0xff]  ;;  %v740_v42 = vld [vmem:[#allocation7 + $0x150] sm:$0xff]  ;;  %v739_v44 = vld [vmem:[#allocation7 + $0x148] sm:$0xff] }
  0x5b   : > { %648 = vmatpush.msra.mxu2 %v496_v14  ;;  %v741_v40 = vld [vmem:[#allocation7 + $0x158] sm:$0xff]  ;;  %v3295_v41 = vld [vmem:[#allocation2 + $0x8] sm:$0xff]  ;;  %v2488_v46 = vld [vmem:[#allocation9 + $0x70] sm:$0xff]  ;;  %p2977_p5 = pneg %p2976_p3 }
  0x5c   : > { %546 = vmatpush.msra.mxu0 %v531_v15  ;;  %v2489_v43 = vld [vmem:[#allocation9 + $0x78] sm:$0xff]  ;;  %v738_v47 = vld [vmem:[#allocation7 + $0x140] sm:$0xff]  ;;  %v2487_v49 = vld [vmem:[#allocation9 + $0x68] sm:$0xff]  ;;  %v562_v15 = vpack.c.bf16 %v3288_v19, %v3284_v16 }
  0x5d   : > { %649 = vmatpush.msra.mxu2 %v495_v18  ;;  %v2481_v45 = vld [vmem:[#allocation9 + $0x38] sm:$0xff]  ;;  %628 = vmatpush.bf16.msra.mxu1 %v2489_v43  ;;  %v736_v50 = vld [vmem:[#allocation7 + $0x130] sm:$0xff]  ;;  %v735_v51 = vld [vmem:[#allocation7 + $0x128] sm:$0xff]  ;;  %p2982_p9 = pnand %p2981_p7, %p2977_p5 }
  0x5e   : > { %547 = vmatpush.msra.mxu0 %v530_v17  ;;  %713 = vmatpush.bf16.msra.mxu3 %v2481_v45  ;;  %v737_v48 = vld [vmem:[#allocation7 + $0x138] sm:$0xff]  ;;  %v2486_v52 = vld [vmem:[#allocation9 + $0x60] sm:$0xff]  ;;  %v732_v56 = vld [vmem:[#allocation7 + $0x110] sm:$0xff] }
  0x5f   : > { %650 = vmatpush.msra.mxu2 %v494_v20  ;;  %v734_v53 = vld [vmem:[#allocation7 + $0x120] sm:$0xff]  ;;  %v733_v54 = vld [vmem:[#allocation7 + $0x118] sm:$0xff]  ;;  %v731_v57 = vld [vmem:[#allocation7 + $0x108] sm:$0xff] }
  0x60   : > { %548 = vmatpush.msra.mxu0 %v529_v21  ;;  %v2485_v55 = vld [vmem:[#allocation9 + $0x58] sm:$0xff]  ;;  %v2484_v58 = vld [vmem:[#allocation9 + $0x50] sm:$0xff]  ;;  %v730_v59 = vld [vmem:[#allocation7 + $0x100] sm:$0xff] }
  0x61   : > { %651 = vmatpush.msra.mxu2 %v493_v22  ;;  %629 = vmatpush.bf16.msra.mxu1 %v2488_v46  ;;  %v3299_v60 = vld [vmem:[#allocation2 + $0x2] sm:$0xff]  ;;  %v3302_v61 = vld [vmem:[#allocation2 + $0xa] sm:$0xff]  ;;  %v2480_v63 = vld [vmem:[#allocation9 + $0x30] sm:$0xff] }
  0x62   : > { %549 = vmatpush.msra.mxu0 %v528_v23  ;;  %v2483_v62 = vld [vmem:[#allocation9 + $0x48] sm:$0xff]  ;;  %714 = vmatpush.bf16.msra.mxu3 %v2480_v63  ;;  %v2482_v0 = vld [vmem:[#allocation9 + $0x40] sm:$0xff]  ;;  %v2497_v2 = vld [vmem:[#allocation9 + $0xb8] sm:$0xff] }
  0x63   : > { %652 = vmatpush.msra.mxu2 %v492_v24  ;;  %v2479_v1 = vld [vmem:[#allocation9 + $0x28] sm:$0xff]  ;;  %v2478_v3 = vld [vmem:[#allocation9 + $0x20] sm:$0xff]  ;;  %v2496_v4 = vld [vmem:[#allocation9 + $0xb0] sm:$0xff] }
  0x64   : > { %550 = vmatpush.msra.mxu0 %v527_v25  ;;  %vm3306_vm2 = vmand %vm470_vm0, %vm471_vm1  ;;  %v473_v6 = vld [vmem:[#allocation3] sm:$0x1]  ;;  %v2477_v7 = vld [vmem:[#allocation9 + $0x18] sm:$0xff] }
  0x65   : > { %653 = vmatpush.msra.mxu2 %v491_v26  ;;  %630 = vmatpush.bf16.msra.mxu1 %v2487_v49  ;;  %v474_v8 = vsel %vm3306_vm2, 0, %v473_v6  ;;  %vm477_vm4 = vmand %vm470_vm0, %vm476_vm3  ;;  %v478_v9 = vld [vmem:[#allocation3 + $0x8] sm:$0x1]  ;;  %v2495_v10 = vld [vmem:[#allocation9 + $0xa8] sm:$0xff] }
  0x66   : > { %551 = vmatpush.msra.mxu0 %v526_v27  ;;  %715 = vmatpush.bf16.msra.mxu3 %v2479_v1  ;;  %475 = vst [vmem:[#allocation3] sm:$0x1] %v474_v8  ;;  %v479_v11 = vsel %vm477_vm4, 0, %v478_v9  ;;  %v2476_v12 = vld [vmem:[#allocation9 + $0x10] sm:$0xff]  ;;  %v2494_v13 = vld [vmem:[#allocation9 + $0xa0] sm:$0xff]  ;;  %v2506_v14 = vld [vmem:[#allocation10 + $0x38] sm:$0xff] }
  0x67   : > { %654 = vmatpush.msra.mxu2 %v490_v28  ;;  %480 = vst [vmem:[#allocation3 + $0x8] sm:$0x1] %v479_v11  ;;  %v2475_v17 = vld [vmem:[#allocation9 + $0x8] sm:$0xff]  ;;  %v2493_v18 = vld [vmem:[#allocation9 + $0x98] sm:$0xff]  ;;  %v2505_v20 = vld [vmem:[#allocation10 + $0x30] sm:$0xff]  ;;  %v503_v28 = vpack.c.bf16 %v3295_v41, %v3291_v36 }
  0x68   : > { %552 = vmatpush.msra.mxu0 %v525_v29  ;;  %v2522_v21 = vld [vmem:[#allocation10 + $0xb8] sm:$0xff]  ;;  %v2474_v22 = vld [vmem:[#allocation9] sm:$0xff]  ;;  %v2492_v23 = vld [vmem:[#allocation9 + $0x90] sm:$0xff] }
  0x69   : > { %655 = vmatpush.msra.mxu2 %v489_v30  ;;  %631 = vmatpush.bf16.msra.mxu1 %v2486_v52  ;;  %v2514_v24 = vld [vmem:[#allocation10 + $0x78] sm:$0xff]  ;;  %v2504_v25 = vld [vmem:[#allocation10 + $0x28] sm:$0xff]  ;;  %v2521_v26 = vld [vmem:[#allocation10 + $0xb0] sm:$0xff] }
  0x6a   : > { %553 = vmatpush.msra.mxu0 %v524_v31  ;;  %716 = vmatpush.bf16.msra.mxu3 %v2478_v3  ;;  %v2491_v29 = vld [vmem:[#allocation9 + $0x88] sm:$0xff]  ;;  %v2513_v30 = vld [vmem:[#allocation10 + $0x70] sm:$0xff]  ;;  %v2503_v31 = vld [vmem:[#allocation10 + $0x20] sm:$0xff] }
  0x6b   : > { %656 = vmatpush.msra.mxu2 %v488_v32  ;;  %v2520_v32 = vld [vmem:[#allocation10 + $0xa8] sm:$0xff]  ;;  %v2509_v46 = vld [vmem:[#allocation10 + $0x50] sm:$0xff]  ;;  %vm3321_vm7 = vmand %vm885_vm6, %vm476_vm3 }
  0x6c   : > { %554 = vmatpush.msra.mxu0 %v523_v33  ;;  %v2490_v33 = vld [vmem:[#allocation9 + $0x80] sm:$0xff]  ;;  %v2500_v43 = vld [vmem:[#allocation10 + $0x8] sm:$0xff]  ;;  %vm3329_vm10 = vmor %vm471_vm1, %vm863_vm9 }
  0x6d   : > { %657 = vmatpush.msra.mxu2 %v487_v35  ;;  %555 = vmatmul.f32.vlgmr.msra.gmra.mxu0 %v3284_v16  ;;  %v2502_v35 = vld [vmem:[#allocation10 + $0x18] sm:$0xff]  ;;  %v887_v6 = vld [vmem:[#allocation3] sm:$0xf] }
  0x6e   : > { %746 = vmatpush.msrb.mxu0 %v745_v34  ;;  %658 = vmatmul.f32.vlgmr.msra.gmra.mxu2 %v3291_v36  ;;  %v2512_v34 = vld [vmem:[#allocation10 + $0x68] sm:$0xff]  ;;  %v769_v36 = vpack.c.bf16 %v3302_v61, %v3299_v60 }
  0x6f   : > { %632 = vmatpush.bf16.msra.mxu1 %v2485_v55  ;;  %717 = vmatpush.bf16.msra.mxu3 %v2477_v7 }
  0x70   : > { %747 = vmatpush.msrb.mxu0 %v744_v37  ;;  %966 = vmatpush.bf16.msrb.mxu2 %v2506_v14  ;;  %v2519_v37 = vld [vmem:[#allocation10 + $0xa0] sm:$0xff] }
  0x72   : > { %748 = vmatpush.msrb.mxu0 %v743_v38  ;;  %v2511_v38 = vld [vmem:[#allocation10 + $0x60] sm:$0xff] }
  0x73   : > { %633 = vmatpush.bf16.msra.mxu1 %v2484_v58  ;;  %718 = vmatpush.bf16.msra.mxu3 %v2476_v12  ;;  %v3054_v58 = vmov -1.0  }
  0x74   : > { %749 = vmatpush.msrb.mxu0 %v742_v39  ;;  %967 = vmatpush.bf16.msrb.mxu2 %v2505_v20  ;;  %v2501_v39 = vld [vmem:[#allocation10 + $0x10] sm:$0xff] }
  0x75   : > { %558 = vmatmul.f32.gmra.mxu0 %v3288_v19 }
  0x76   : > { %750 = vmatpush.msrb.mxu0 %v741_v40  ;;  %661 = vmatmul.f32.gmra.mxu2 %v3295_v41  ;;  %v2518_v41 = vld [vmem:[#allocation10 + $0x98] sm:$0xff] }
  0x77   : > { %634 = vmatpush.bf16.msra.mxu1 %v2483_v62  ;;  %719 = vmatpush.bf16.msra.mxu3 %v2475_v17 }
  0x78   : > { %751 = vmatpush.msrb.mxu0 %v740_v42  ;;  %968 = vmatpush.bf16.msrb.mxu2 %v2504_v25  ;;  %v2510_v42 = vld [vmem:[#allocation10 + $0x58] sm:$0xff] }
  0x7a   : > { %752 = vmatpush.msrb.mxu0 %v739_v44  ;;  %v2517_v44 = vld [vmem:[#allocation10 + $0x90] sm:$0xff] }
  0x7b   : > { %635 = vmatpush.bf16.msra.mxu1 %v2482_v0  ;;  %720 = vmatpush.bf16.msra.mxu3 %v2474_v22 }
  0x7c   : > { %753 = vmatpush.msrb.mxu0 %v738_v47  ;;  %969 = vmatpush.bf16.msrb.mxu2 %v2503_v31  ;;  %v2499_v47 = vld [vmem:[#allocation10] sm:$0xff] }
  0x7e   : > { %754 = vmatpush.msrb.mxu0 %v737_v48  ;;  %636 = vmatmul.bf16.vlgmr.msra.gmra.mxu1 %v562_v15  ;;  %v2516_v48 = vld [vmem:[#allocation10 + $0x88] sm:$0xff]  ;;  %v891_v15 = vld [vmem:[#allocation3 + $0x8] sm:$0x1] }
  0x7f   : > { %835 = vmatpush.bf16.msrb.mxu1 %v2497_v2  ;;  %1072 = vmatpush.bf16.msrb.mxu3 %v2514_v24 }
  0x80   : > { %755 = vmatpush.msrb.mxu0 %v736_v50  ;;  %721 = vmatmul.bf16.vlgmr.msra.gmra.mxu3 %v503_v28  ;;  %v2712_v50 = vld [vmem:[#allocation12] ss:$0 sm:$0xff] }
  0x81   : > { %970 = vmatpush.bf16.msrb.mxu2 %v2502_v35 }
  0x82   : > { %756 = vmatpush.msrb.mxu0 %v735_v51 }
  0x83   : > { %836 = vmatpush.bf16.msrb.mxu1 %v2496_v4  ;;  %1073 = vmatpush.bf16.msrb.mxu3 %v2513_v30 }
  0x84   : > { %757 = vmatpush.msrb.mxu0 %v734_v53  ;;  %v2508_v53 = vld [vmem:[#allocation10 + $0x48] sm:$0xff] }
  0x85   : > { %971 = vmatpush.bf16.msrb.mxu2 %v2501_v39 }
  0x86   : > { %758 = vmatpush.msrb.mxu0 %v733_v54  ;;  %v2515_v54 = vld [vmem:[#allocation10 + $0x80] sm:$0xff] }
  0x87   : > { %837 = vmatpush.bf16.msrb.mxu1 %v2495_v10  ;;  %1074 = vmatpush.bf16.msrb.mxu3 %v2512_v34 }
  0x88   : > { %759 = vmatpush.msrb.mxu0 %v732_v56  ;;  %v2507_v56 = vld [vmem:[#allocation10 + $0x40] sm:$0xff] }
  0x89   : > { %972 = vmatpush.bf16.msrb.mxu2 %v2500_v43  ;;  %v1245_v43 = vld [vmem:[#allocation13 + $0xe8] sm:$0xff] }
  0x8a   : > { %760 = vmatpush.msrb.mxu0 %v731_v57 }
  0x8b   : > { %838 = vmatpush.bf16.msrb.mxu1 %v2494_v13  ;;  %1075 = vmatpush.bf16.msrb.mxu3 %v2511_v38 }
  0x8c   : > { %761 = vmatpush.msrb.mxu0 %v730_v59 }
  0x8d   : > { %762 = vmatmul.f32.vlgmr.msrb.gmra.mxu0 %v3299_v60  ;;  %973 = vmatpush.bf16.msrb.mxu2 %v2499_v47  ;;  %v2538_v47 = vld [vmem:[#allocation15 + $0x78] sm:$0xff] }
  0x8e   : > { %1162 = vmatpush.bf16.msra.mxu0 %v2522_v21 }
  0x8f   : > { %839 = vmatpush.bf16.msrb.mxu1 %v2493_v18  ;;  %1076 = vmatpush.bf16.msrb.mxu3 %v2510_v42  ;;  %v1246_v42 = vld [vmem:[#allocation13 + $0xf0] sm:$0xff] }
  0x91   : > { %1337 = vmatpush.bf16.msra.mxu2 %v2538_v47  ;;  %v1443_v47 = vld [vmem:[#allocation13 + $0x120] sm:$0xff] }
  0x92   : > { %1163 = vmatpush.bf16.msra.mxu0 %v2521_v26 }
  0x93   : > { %840 = vmatpush.bf16.msrb.mxu1 %v2492_v23  ;;  %1077 = vmatpush.bf16.msrb.mxu3 %v2509_v46  ;;  %v1242_v46 = vld [vmem:[#allocation13 + $0xd0] sm:$0xff] }
  0x95   : > { %765 = vmatmul.f32.gmra.mxu0 %v3302_v61 }
  0x96   : > { %1164 = vmatpush.bf16.msra.mxu0 %v2520_v32 }
  0x97   : > { %841 = vmatpush.bf16.msrb.mxu1 %v2491_v29  ;;  %1078 = vmatpush.bf16.msrb.mxu3 %v2508_v53  ;;  %v1239_v53 = vld [vmem:[#allocation13 + $0xb8] sm:$0xff] }
  0x9a   : > { %1165 = vmatpush.bf16.msra.mxu0 %v2519_v37 }
  0x9b   : > { %842 = vmatpush.bf16.msrb.mxu1 %v2490_v33  ;;  %1079 = vmatpush.bf16.msrb.mxu3 %v2507_v56  ;;  %v1237_v56 = vld [vmem:[#allocation13 + $0xa8] sm:$0xff] }
  0x9e   : > { %843 = vmatmul.bf16.vlgmr.msrb.gmra.mxu1 %v769_v36  ;;  %1166 = vmatpush.bf16.msra.mxu0 %v2518_v41  ;;  %v1247_v41 = vld [vmem:[#allocation13 + $0xf8] sm:$0xff] }
  0x9f   : > { %1248 = vmatpush.msra.mxu1 %v1247_v41  ;;  %v1445_v41 = vld [vmem:[#allocation13 + $0x130] sm:$0xff] }
  0xa1   : > { %1249 = vmatpush.msra.mxu1 %v1246_v42  ;;  %v1197_v42 = vld [vmem:[#allocation13 + $0x8] sm:$0xff] }
  0xa2   : > { %1167 = vmatpush.bf16.msra.mxu0 %v2517_v44  ;;  %v1244_v44 = vld [vmem:[#allocation13 + $0xe0] sm:$0xff] }
  0xa3   : > { %1250 = vmatpush.msra.mxu1 %v1245_v43  ;;  %v1444_v43 = vld [vmem:[#allocation13 + $0x128] sm:$0xff] }
  0xa5   : > { %1251 = vmatpush.msra.mxu1 %v1244_v44  ;;  %v2525_v44 = vld [vmem:[#allocation15 + $0x10] sm:$0xff] }
  0xa6   : > { %1168 = vmatpush.bf16.msra.mxu0 %v2516_v48  ;;  %v1211_v48 = vld [vmem:[#allocation13 + $0x78] sm:$0xff] }
  0xa7   : > { %1351 = vmatpush.msra.mxu3 %v1211_v48  ;;  %v2524_v48 = vld [vmem:[#allocation15 + $0x8] sm:$0xff] }
  0xaa   : > { %1169 = vmatpush.bf16.msra.mxu0 %v2515_v54  ;;  %v1238_v54 = vld [vmem:[#allocation13 + $0xb0] sm:$0xff] }
  0xea   : > { %v556_v27 = vpop.f32.mrf.mxu0 }
  0xf1   : > { %v659_v45 = vpop.f32.mrf.mxu2 }
  0xf2   : > { %v559_v40 = vpop.f32.mrf.mxu0  ;;  %v660_v49 = vadd.f32 %v659_v45, %v556_v27  ;;  %v1243_v45 = vld [vmem:[#allocation13 + $0xd8] sm:$0xff] }
  0xf3   : > { %1252 = vmatpush.msra.mxu1 %v1243_v45  ;;  %v2543_v45 = vld [vmem:[#allocation15 + $0xa0] sm:$0xff] }
  0xf5   : > { %1253 = vmatpush.msra.mxu1 %v1242_v46  ;;  %v1196_v46 = vld [vmem:[#allocation13] sm:$0xff] }
  0xf9   : > { %v662_v57 = vpop.f32.mrf.mxu2 }
  0xfa   : > { %v663_v60 = vadd.f32 %v662_v57, %v559_v40  ;;  %v1236_v57 = vld [vmem:[#allocation13 + $0xa0] sm:$0xff] }
 0x10a   : > { %v763_v51 = vpop.f32.mrf.mxu0 }
 0x10b   : > { %v849_v52 = vadd.f32 %v763_v51, %v660_v49  ;;  %v1241_v49 = vld [vmem:[#allocation13 + $0xc8] sm:$0xff]  ;;  %v2537_v51 = vld [vmem:[#allocation15 + $0x70] sm:$0xff] }
 0x10c   : > { %1254 = vmatpush.msra.mxu1 %v1241_v49  ;;  %1338 = vmatpush.bf16.msra.mxu2 %v2537_v51  ;;  %v1442_v49 = vld [vmem:[#allocation13 + $0x118] sm:$0xff]  ;;  %v1441_v51 = vld [vmem:[#allocation13 + $0x110] sm:$0xff] }
 0x10d   : > { %v855_v55 = vadd.f32 %v2712_v50, %v849_v52  ;;  %v1240_v52 = vld [vmem:[#allocation13 + $0xc0] sm:$0xff] }
 0x10e   : > { %1255 = vmatpush.msra.mxu1 %v1240_v52  ;;  %v2523_v52 = vld [vmem:[#allocation15] sm:$0xff] }
 0x10f   : > { %vm857_vm5 = vcmp.gt.f32.partialorder %v855_v55, 0.0  ;;  %v2536_v55 = vld [vmem:[#allocation15 + $0x68] sm:$0xff] }
 0x110   : > { %v859_v59 = vsel %vm857_vm5, 1.0, %v3054_v58  ;;  %1256 = vmatpush.msra.mxu1 %v1239_v53  ;;  %1339 = vmatpush.bf16.msra.mxu2 %v2536_v55  ;;  %v1440_v55 = vld [vmem:[#allocation13 + $0x108] sm:$0xff] }
 0x111   : > { %v861_v61 = vpack.c.bf16 %v859_v59, %v859_v59  ;;  %v2535_v59 = vld [vmem:[#allocation15 + $0x60] sm:$0xff] }
 0x112   : > { %v766_v62 = vpop.f32.mrf.mxu0  ;;  %1257 = vmatpush.msra.mxu1 %v1238_v54 }
 0x113   : > { %v866_v63 = vshrl.u32 %v861_v61, 16  ;;  %v850_v0 = vadd.f32 %v766_v62, %v663_v60  ;;  %v869_v2 = vshll.u32 %v861_v61, 16  ;;  %v1235_v60 = vld [vmem:[#allocation13 + $0x98] sm:$0xff]  ;;  %v1234_v61 = vld [vmem:[#allocation13 + $0x90] sm:$0xff]  ;;  %v1209_v62 = vld [vmem:[#allocation13 + $0x68] sm:$0xff] }
 0x114   : > { %1258 = vmatpush.msra.mxu1 %v1237_v56  ;;  %1340 = vmatpush.bf16.msra.mxu2 %v2535_v59 }
 0x115   : > { %v868_v1 = vrot.slane %v866_v63, 7  ;;  %v856_v3 = vadd.f32 %v2712_v50, %v850_v0  ;;  %v1210_v50 = vld [vmem:[#allocation13 + $0x70] sm:$0xff]  ;;  %v1208_v63 = vld [vmem:[#allocation13 + $0x60] sm:$0xff]  ;;  %v2530_v0 = vld [vmem:[#allocation15 + $0x38] sm:$0xff] }
 0x116   : > { %1352 = vmatpush.msra.mxu3 %v1210_v50  ;;  %1259 = vmatpush.msra.mxu1 %v1236_v57  ;;  %v2542_v50 = vld [vmem:[#allocation15 + $0x98] sm:$0xff]  ;;  %v2541_v57 = vld [vmem:[#allocation15 + $0x90] sm:$0xff] }
 0x117   : > { %v871_v7 = vor.u32 %v869_v2, %v868_v1  ;;  %vm858_vm8 = vcmp.gt.f32.partialorder %v856_v3, 0.0  ;;  %v872_v17 = vrot.slane %v868_v1, 4  ;;  %v1233_v1 = vld [vmem:[#allocation13 + $0x88] sm:$0xff]  ;;  %v1207_v2 = vld [vmem:[#allocation13 + $0x58] sm:$0xff]  ;;  %1422 = vmatpush.bf16.msrb.mxu0 %v2530_v0 }
 0x118   : > { %v860_v8 = vsel %vm858_vm8, 1.0, %v3054_v58  ;;  %1260 = vmatpush.msra.mxu1 %v1235_v60  ;;  %1353 = vmatpush.msra.mxu3 %v1209_v62  ;;  %v2534_v3 = vld [vmem:[#allocation15 + $0x58] sm:$0xff]  ;;  %v1439_v60 = vld [vmem:[#allocation13 + $0x100] sm:$0xff]  ;;  %v2540_v62 = vld [vmem:[#allocation15 + $0x88] sm:$0xff] }
 0x119   : > { %v888_v9 = vsel %vm3321_vm7, %v871_v7, %v887_v6  ;;  %v862_v10 = vpack.c.bf16 %v860_v8, %v860_v8  ;;  %v1232_v6 = vld [vmem:[#allocation13 + $0x80] sm:$0xff]  ;;  %v1206_v7 = vld [vmem:[#allocation13 + $0x50] sm:$0xff]  ;;  %1341 = vmatpush.bf16.msra.mxu2 %v2534_v3  ;;  %v1454_v8 = vld [vmem:[#allocation13 + $0x178] sm:$0xff] }
 0x11a   : > { %889 = vst [vmem:[#allocation3] sm:$0xf] %v888_v9  ;;  %1261 = vmatpush.msra.mxu1 %v1234_v61  ;;  %1354 = vmatpush.msra.mxu3 %v1208_v63  ;;  %v2533_v9 = vld [vmem:[#allocation15 + $0x50] sm:$0xff] }
 0x11b   : > { %v874_v11 = vshrl.u32 %v862_v10, 16  ;;  %v877_v13 = vshll.u32 %v862_v10, 16  ;;  %v1453_v10 = vld [vmem:[#allocation13 + $0x170] sm:$0xff] }
 0x11c   : > { %1262 = vmatpush.msra.mxu1 %v1233_v1  ;;  %1355 = vmatpush.msra.mxu3 %v1207_v2 }
 0x11d   : > { %v876_v12 = vrot.slane %v874_v11, 7  ;;  %v1205_v11 = vld [vmem:[#allocation13 + $0x48] sm:$0xff]  ;;  %1342 = vmatpush.bf16.msra.mxu2 %v2533_v9 }
 0x11e   : > { %1263 = vmatpush.msra.mxu1 %v1232_v6  ;;  %1356 = vmatpush.msra.mxu3 %v1206_v7  ;;  %v2713_v6 = vld [vmem:[#allocation12 + $0x1] ss:$0 sm:$0xff]  ;;  %v2539_v7 = vld [vmem:[#allocation15 + $0x80] sm:$0xff] }
 0x11f   : > { %v879_v18 = vor.u32 %v877_v13, %v876_v12  ;;  %v881_v20 = vrot.slane %v876_v12, 4  ;;  %v1452_v12 = vld [vmem:[#allocation13 + $0x168] sm:$0xff] }
 0x120   : > { %1455 = vmatpush.msrb.mxu1 %v1454_v8  ;;  %v2532_v13 = vld [vmem:[#allocation15 + $0x48] sm:$0xff]  ;;  %1357 = vmatpush.msra.mxu3 %v1205_v11 }
 0x121   : > { %v880_v21 = vsel %vm3329_vm10, %v872_v17, %v879_v18  ;;  %v892_v22 = vsel %vm3306_vm2, %v881_v20, %v891_v15  ;;  %v2582_v27 = vld [vmem:[#allocation3] sm:$0xe]  ;;  %v1204_v17 = vld [vmem:[#allocation13 + $0x40] sm:$0xff]  ;;  %v3339_v20 = vpop.f32.mrf.mxu1  ;;  %1343 = vmatpush.bf16.msra.mxu2 %v2532_v13 }
 0x122   : > { %890 = vst [vmem:[#allocation3 + $0x4] sm:$0xf] %v880_v21  ;;  %1456 = vmatpush.msrb.mxu1 %v1453_v10  ;;  %v2529_v15 = vld [vmem:[#allocation15 + $0x30] sm:$0xff]  ;;  %v1451_v18 = vld [vmem:[#allocation13 + $0x160] sm:$0xff]  ;;  %1358 = vmatpush.msra.mxu3 %v1204_v17  ;;  %v1203_v21 = vld [vmem:[#allocation13 + $0x38] sm:$0xff] }
 0x123   : > { %893 = vst [vmem:[#allocation3 + $0x8] sm:$0x1] %v892_v22  ;;  %1423 = vmatpush.bf16.msrb.mxu0 %v2529_v15  ;;  %v1450_v22 = vld [vmem:[#allocation13 + $0x158] sm:$0xff] }
 0x124   : > { %1457 = vmatpush.msrb.mxu1 %v1452_v12  ;;  %1359 = vmatpush.msra.mxu3 %v1203_v21  ;;  %v2714_v10 = vld [vmem:[#allocation12 + $0x2] ss:$0 sm:$0xff] }
 0x126   : > { %1458 = vmatpush.msrb.mxu1 %v1451_v18 }
 0x128   : > { %1459 = vmatpush.msrb.mxu1 %v1450_v22 }
 0x129   : > { %v2498_v23 = vld [vmem:[#allocation3] sm:$0xff] }
 0x12a   : > { %v2581_v24 = vld [vmem:[#allocation3] sm:$0xf0]  ;;  %v984_v26 = vld [vmem:[#allocation3 + $0x8] sm:$0x1]  ;;  %974 = vmatmul.bf16.vlgmr.msrb.gmra.mxu2 %v2498_v23  ;;  %v2531_v23 = vld [vmem:[#allocation15 + $0x40] sm:$0xff] }
 0x12b   : > { %v2574_v25 = vld [vmem:[#allocation3] sm:$0xff]   ;;  %v1007_v29 = vunpack.c.l.b16 %v984_v26  ;;  %v2583_v30 = vor.u32 %v2582_v27, %v2581_v24  ;;  %v2528_v24 = vld [vmem:[#allocation15 + $0x28] sm:$0xff]  ;;  %1344 = vmatpush.bf16.msra.mxu2 %v2531_v23 }
 0x12c   : > { %v1014_v28 = vshll.u32 %v2574_v25, 16  ;;  %v1012_v35 = vshrl.u32 %v2574_v25, 16  ;;  %v2546_v25 = vld [vmem:[#allocation15 + $0xb8] sm:$0xff]  ;;  %v1202_v26 = vld [vmem:[#allocation13 + $0x30] sm:$0xff]  ;;  %1424 = vmatpush.bf16.msrb.mxu0 %v2528_v24 }
 0x12d   : > { %v1009_v31 = vpack.c.b16 %v1007_v29, %v1007_v29  ;;  %v1110_v33 = vrot.slane %v2583_v30, 1  ;;  %v1449_v27 = vld [vmem:[#allocation13 + $0x150] sm:$0xff]  ;;  %1360 = vmatpush.msra.mxu3 %v1202_v26  ;;  %v1448_v29 = vld [vmem:[#allocation13 + $0x148] sm:$0xff]  ;;  %v2527_v30 = vld [vmem:[#allocation15 + $0x20] sm:$0xff] }
 0x12e   : > { %v1016_v32 = vrot.slane %v1014_v28, 1  ;;  %v1201_v28 = vld [vmem:[#allocation13 + $0x28] sm:$0xff]  ;;  %1460 = vmatpush.msrb.mxu1 %v1449_v27 }
 0x12f   : > { %v1111_v34 = vrot.slane %v1009_v31, 1  ;;  %v1019_v37 = vshll.u32 %v1009_v31, 16  ;;  %1361 = vmatpush.msra.mxu3 %v1201_v28  ;;  %1544 = vmatpush.bf16.msrb.mxu2 %v2546_v25  ;;  %v2545_v31 = vld [vmem:[#allocation15 + $0xb0] sm:$0xff] }
 0x130   : > { %v1017_v38 = vor.u32 %v1016_v32, %v1012_v35  ;;  %v1200_v32 = vld [vmem:[#allocation13 + $0x20] sm:$0xff]  ;;  %1461 = vmatpush.msrb.mxu1 %v1448_v29  ;;  %1425 = vmatpush.bf16.msrb.mxu0 %v2527_v30  ;;  %v1446_v35 = vld [vmem:[#allocation13 + $0x138] sm:$0xff] }
 0x131   : > { %v1112_v36 = vsel %vm1109_vm11, %v1110_v33, %v1111_v34  ;;  %v1021_v39 = vrot.slane %v1019_v37, 1  ;;  %v1447_v33 = vld [vmem:[#allocation13 + $0x140] sm:$0xff]  ;;  %1362 = vmatpush.msra.mxu3 %v1200_v32  ;;  %v1199_v34 = vld [vmem:[#allocation13 + $0x18] sm:$0xff] }
 0x132   : > { %1170 = vmatmul.bf16.vlgmr.msra.gmra.mxu0 %v1112_v36  ;;  %1462 = vmatpush.msrb.mxu1 %v1447_v33  ;;  %v2526_v37 = vld [vmem:[#allocation15 + $0x18] sm:$0xff]  ;;  %v2544_v36 = vld [vmem:[#allocation15 + $0xa8] sm:$0xff] }
 0x133   : > { %v1022_v40 = vsel %vm1010_vm12, %v1017_v38, %v1021_v39  ;;  %1363 = vmatpush.msra.mxu3 %v1199_v34  ;;  %1545 = vmatpush.bf16.msrb.mxu2 %v2545_v31  ;;  %v639_v38 = vpop.f32.mrf.mxu1  ;;  %v722_v39 = vpop.f32.mrf.mxu3  ;;  %v2555_v34 = vld [vmem:[#allocation16 + $0x38] sm:$0xff] }
 0x134   : > { %1080 = vmatmul.bf16.vlgmr.msrb.gmra.mxu3 %v1022_v40  ;;  %v1198_v40 = vld [vmem:[#allocation13 + $0x10] sm:$0xff]  ;;  %1463 = vmatpush.msrb.mxu1 %v1446_v35  ;;  %v723_v56 = vadd.f32 %v722_v39, %v3339_v20 }
 0x135   : > { %1364 = vmatpush.msra.mxu3 %v1198_v40  ;;  %1426 = vmatpush.bf16.msrb.mxu0 %v2526_v37  ;;  %v2554_v35 = vld [vmem:[#allocation16 + $0x30] sm:$0xff]  ;;  %v2571_v37 = vld [vmem:[#allocation16 + $0xb8] sm:$0xff] }
 0x136   : > { %1464 = vmatpush.msrb.mxu1 %v1445_v41  ;;  %v2570_v39 = vld [vmem:[#allocation16 + $0xb0] sm:$0xff]  ;;  %v2552_v41 = vld [vmem:[#allocation16 + $0x20] sm:$0xff] }
 0x137   : > { %1365 = vmatpush.msra.mxu3 %v1197_v42  ;;  %1546 = vmatpush.bf16.msrb.mxu2 %v2544_v36  ;;  %v2563_v36 = vld [vmem:[#allocation16 + $0x78] sm:$0xff]  ;;  %v2562_v40 = vld [vmem:[#allocation16 + $0x70] sm:$0xff]  ;;  %v2569_v42 = vld [vmem:[#allocation16 + $0xa8] sm:$0xff] }
 0x138   : > { %1465 = vmatpush.msrb.mxu1 %v1444_v43 }
 0x139   : > { %1366 = vmatpush.msra.mxu3 %v1196_v46  ;;  %1427 = vmatpush.bf16.msrb.mxu0 %v2525_v44  ;;  %v2561_v44 = vld [vmem:[#allocation16 + $0x68] sm:$0xff]  ;;  %v2568_v46 = vld [vmem:[#allocation16 + $0xa0] sm:$0xff] }
 0x13a   : > { %1466 = vmatpush.msrb.mxu1 %v1443_v47  ;;  %v2560_v47 = vld [vmem:[#allocation16 + $0x60] sm:$0xff] }
 0x13b   : > { %1547 = vmatpush.bf16.msrb.mxu2 %v2543_v45  ;;  %v844_v53 = vpop.f32.mrf.mxu1  ;;  %v724_v54 = vpop.f32.mrf.mxu3  ;;  %1671 = vmatpush.bf16.msrb.mxu3 %v2555_v34  ;;  %v2551_v45 = vld [vmem:[#allocation16 + $0x18] sm:$0xff] }
 0x13c   : > { %1467 = vmatpush.msrb.mxu1 %v1442_v49  ;;  %v851_v61 = vadd.f32 %v844_v53, %v723_v56  ;;  %v725_v2 = vadd.f32 %v724_v54, %v639_v38  ;;  %v2553_v38 = vld [vmem:[#allocation16 + $0x28] sm:$0xff]  ;;  %v2567_v49 = vld [vmem:[#allocation16 + $0x98] sm:$0xff]  ;;  %v2566_v53 = vld [vmem:[#allocation16 + $0x90] sm:$0xff] }
 0x13d   : > { %1428 = vmatpush.bf16.msrb.mxu0 %v2524_v48  ;;  %v2550_v48 = vld [vmem:[#allocation16 + $0x10] sm:$0xff]  ;;  %v2565_v56 = vld [vmem:[#allocation16 + $0x88] sm:$0xff] }
 0x13e   : > { %1468 = vmatpush.msrb.mxu1 %v1441_v51  ;;  %v2559_v51 = vld [vmem:[#allocation16 + $0x58] sm:$0xff]  ;;  %v2558_v54 = vld [vmem:[#allocation16 + $0x50] sm:$0xff] }
 0x13f   : > { %1548 = vmatpush.bf16.msrb.mxu2 %v2542_v50  ;;  %1672 = vmatpush.bf16.msrb.mxu3 %v2554_v35 }
 0x140   : > { %1469 = vmatpush.msrb.mxu1 %v1440_v55  ;;  %v2548_v55 = vld [vmem:[#allocation16] sm:$0xff] }
 0x141   : > { %1429 = vmatpush.bf16.msrb.mxu0 %v2523_v52  ;;  %v2549_v52 = vld [vmem:[#allocation16 + $0x8] sm:$0xff] }
 0x142   : > { %1470 = vmatpush.msrb.mxu1 %v1439_v60  ;;  %v2715_v60 = vld [vmem:[%s3418_s8] ss:$0 sm:$0xff] }
 0x143   : > { %1549 = vmatpush.bf16.msrb.mxu2 %v2541_v57  ;;  %v846_v8 = vpop.f32.mrf.mxu1  ;;  %1673 = vmatpush.bf16.msrb.mxu3 %v2553_v38 }
 0x144   : > { %v852_v12 = vadd.f32 %v846_v8, %v725_v2  ;;  %v2556_v2 = vld [vmem:[#allocation16 + $0x40] sm:$0xff] }
 0x145   : > { %1776 = vmatpush.bf16.msra.mxu0 %v2563_v36 }
 0x147   : > { %1550 = vmatpush.bf16.msrb.mxu2 %v2540_v62  ;;  %1674 = vmatpush.bf16.msrb.mxu3 %v2552_v41 }
 0x149   : > { %1777 = vmatpush.bf16.msra.mxu0 %v2562_v40 }
 0x14b   : > { %1551 = vmatpush.bf16.msrb.mxu2 %v2539_v7  ;;  %1675 = vmatpush.bf16.msrb.mxu3 %v2551_v45 }
 0x14d   : > { %1778 = vmatpush.bf16.msra.mxu0 %v2561_v44 }
 0x14f   : > { %1676 = vmatpush.bf16.msrb.mxu3 %v2550_v48 }
 0x151   : > { %1779 = vmatpush.bf16.msra.mxu0 %v2560_v47 }
 0x153   : > { %1677 = vmatpush.bf16.msrb.mxu3 %v2549_v52 }
 0x155   : > { %1780 = vmatpush.bf16.msra.mxu0 %v2559_v51 }
 0x157   : > { %1678 = vmatpush.bf16.msrb.mxu3 %v2548_v55 }
 0x159   : > { %1781 = vmatpush.bf16.msra.mxu0 %v2558_v54 }
 0x1ad   : > { %v975_v59 = vpop.f32.mrf.mxu2 }
 0x1ae   : > { %v980_v63 = vadd.f32 %v975_v59, %v851_v61 }
 0x1af   : > { %v1171_v0 = vpop.f32.mrf.mxu0 }
 0x1b5   : > { %v977_v11 = vpop.f32.mrf.mxu2 }
 0x1b6   : > { %v981_v17 = vadd.f32 %v977_v11, %v852_v12 }
 0x1b7   : > { %v1081_v1 = vpop.f32.mrf.mxu3  ;;  %v1173_v23 = vpop.f32.mrf.mxu0 }
 0x1b8   : > { %v1086_v3 = vadd.f32 %v1081_v1, %v980_v63  ;;  %v2557_v63 = vld [vmem:[#allocation16 + $0x48] sm:$0xff] }
 0x1b9   : > { %1782 = vmatpush.bf16.msra.mxu0 %v2557_v63  ;;  %v2717_v63 = vld [vmem:[%s3418_s8 + $0x2] ss:$0 sm:$0xff] }
 0x1ba   : > { %v1176_v9 = vadd.f32 %v1171_v0, %v1086_v3  ;;  %v2564_v0 = vld [vmem:[#allocation16 + $0x80] sm:$0xff] }
 0x1bc   : > { %v1180_v13 = vadd.f32 %v2713_v6, %v1176_v9 }
 0x1bd   : > { %1783 = vmatpush.bf16.msra.mxu0 %v2556_v2 }
 0x1be   : > { %vm1182_vm13 = vcmp.ge.f32.partialorder %v1180_v13, 0.0  ;;  %v1186_v15 = vmul.f32 %v2714_v10, %v1180_v13 }
 0x1bf   : > { %v1083_v18 = vpop.f32.mrf.mxu3 }
 0x1c0   : > { %v1188_v20 = vsel %vm1182_vm13, %v1180_v13, %v1186_v15  ;;  %v1087_v21 = vadd.f32 %v1083_v18, %v981_v17  ;;  %v1592_v18 = vld [vmem:[#allocation3] sm:$0xf] }
 0x1c1   : > { %v3343_v22 = vadd.f32 %v1188_v20, %v3284_v16 }
 0x1c2   : > { %v1177_v24 = vadd.f32 %v1173_v23, %v1087_v21 }
 0x1c3   : > { %1192 = vst [vmem:[#allocation2 + $0x1] sm:$0xff] %v3343_v22  ;;  %1264 = vmatmul.f32.vlgmr.msra.gmra.mxu1 %v3343_v22 }
 0x1c4   : > { %v1181_v25 = vadd.f32 %v2713_v6, %v1177_v24  ;;  %1865 = vmatpush.bf16.msra.mxu1 %v2571_v37 }
 0x1c6   : > { %vm1183_vm14 = vcmp.ge.f32.partialorder %v1181_v25, 0.0  ;;  %v1187_v26 = vmul.f32 %v2714_v10, %v1181_v25 }
 0x1c8   : > { %v1189_v27 = vsel %vm1183_vm14, %v1181_v25, %v1187_v26  ;;  %1866 = vmatpush.bf16.msra.mxu1 %v2570_v39 }
 0x1c9   : > { %v3348_v28 = vadd.f32 %v1189_v27, %v3288_v19 }
 0x1ca   : > { %v1194_v29 = vld [vmem:[#allocation2] sm:$0xff] }
 0x1cb   : > { %1193 = vst [vmem:[#allocation2 + $0x9] sm:$0xff] %v3348_v28  ;;  %1367 = vmatmul.f32.vlgmr.msra.gmra.mxu3 %v1194_v29  ;;  %1267 = vmatmul.f32.gmra.mxu1 %v3348_v28  ;;  %v1271_v16 = vpack.c.bf16 %v3348_v28, %v3343_v22 }
 0x1cc   : > { %1867 = vmatpush.bf16.msra.mxu1 %v2569_v42 }
 0x1cd   : > { %1345 = vmatmul.bf16.vlgmr.msra.gmra.mxu2 %v1271_v16 }
 0x1d0   : > { %1868 = vmatpush.bf16.msra.mxu1 %v2568_v46 }
 0x1d2   : > { %v1195_v30 = vld [vmem:[#allocation2 + $0x8] sm:$0xff] }
 0x1d3   : > { %v1436_v31 = vld [vmem:[#allocation2 + $0x2] sm:$0xff]  ;;  %v1212_v32 = vpack.c.bf16 %v1195_v30, %v1194_v29  ;;  %1370 = vmatmul.f32.gmra.mxu3 %v1195_v30  ;;  %v1437_v33 = vld [vmem:[#allocation2 + $0xa] sm:$0xff]  ;;  %v1596_v30 = vld [vmem:[#allocation3 + $0x8] sm:$0x1] }
 0x1d4   : > { %1471 = vmatmul.f32.vlgmr.msrb.gmra.mxu1 %v1436_v31  ;;  %v1478_v19 = vpack.c.bf16 %v1437_v33, %v1436_v31 }
 0x1d5   : > { %1430 = vmatmul.bf16.vlgmr.msrb.gmra.mxu0 %v1212_v32  ;;  %1869 = vmatpush.bf16.msra.mxu1 %v2567_v49 }
 0x1d9   : > { %1870 = vmatpush.bf16.msra.mxu1 %v2566_v53 }
 0x1dc   : > { %1474 = vmatmul.f32.gmra.mxu1 %v1437_v33 }
 0x1dd   : > { %1552 = vmatmul.bf16.vlgmr.msrb.gmra.mxu2 %v1478_v19  ;;  %1871 = vmatpush.bf16.msra.mxu1 %v2565_v56 }
 0x1e1   : > { %1872 = vmatpush.bf16.msra.mxu1 %v2564_v0 }
 0x240   : > { %v1265_v43 = vpop.f32.mrf.mxu1 }
 0x248   : > { %v1268_v50 = vpop.f32.mrf.mxu1 }
 0x24e   : > { %v1368_v57 = vpop.f32.mrf.mxu3 }
 0x24f   : > { %v1369_v59 = vadd.f32 %v1368_v57, %v1265_v43 }
 0x250   : > { %v1346_v46 = vpop.f32.mrf.mxu2 }
 0x251   : > { %v1472_v61 = vpop.f32.mrf.mxu1 }
 0x252   : > { %v1558_v62 = vadd.f32 %v1472_v61, %v1369_v59  ;;  %v1431_v48 = vpop.f32.mrf.mxu0 }
 0x253   : > { %v1432_v51 = vadd.f32 %v1431_v48, %v1346_v46 }
 0x254   : > { %v1564_v1 = vadd.f32 %v2715_v60, %v1558_v62 }
 0x256   : > { %vm1566_vm15 = vcmp.gt.f32.partialorder %v1564_v1, 0.0  ;;  %v1371_v3 = vpop.f32.mrf.mxu3 }
 0x257   : > { %v1568_v6 = vsel %vm1566_vm15, 1.0, %v3054_v58  ;;  %v1372_v7 = vadd.f32 %v1371_v3, %v1268_v50 }
 0x258   : > { %v1570_v8 = vpack.c.bf16 %v1568_v6, %v1568_v6  ;;  %v1348_v47 = vpop.f32.mrf.mxu2 }
 0x259   : > { %v1475_v9 = vpop.f32.mrf.mxu1 }
 0x25a   : > { %v1573_v10 = vshrl.u32 %v1570_v8, 16  ;;  %v1559_v11 = vadd.f32 %v1475_v9, %v1372_v7  ;;  %v1576_v13 = vshll.u32 %v1570_v8, 16  ;;  %v1433_v50 = vpop.f32.mrf.mxu0 }
 0x25b   : > { %v1434_v61 = vadd.f32 %v1433_v50, %v1348_v47 }
 0x25c   : > { %v1575_v12 = vrot.slane %v1573_v10, 7  ;;  %v1565_v15 = vadd.f32 %v2715_v60, %v1559_v11  ;;  %v2716_v60 = vld [vmem:[%s3418_s8 + $0x1] ss:$0 sm:$0xff] }
 0x25e   : > { %v1578_v17 = vor.u32 %v1576_v13, %v1575_v12  ;;  %vm1567_vm0 = vcmp.gt.f32.partialorder %v1565_v15, 0.0  ;;  %v1579_v27 = vrot.slane %v1575_v12, 4 }
 0x25f   : > { %v1569_v20 = vsel %vm1567_vm0, 1.0, %v3054_v58 }
 0x260   : > { %v1593_v21 = vsel %vm3321_vm7, %v1578_v17, %v1592_v18  ;;  %v1571_v23 = vpack.c.bf16 %v1569_v20, %v1569_v20  ;;  %v1553_v49 = vpop.f32.mrf.mxu2 }
 0x261   : > { %1594 = vst [vmem:[#allocation3] sm:$0xf] %v1593_v21  ;;  %v1560_v52 = vadd.f32 %v1553_v49, %v1432_v51 }
 0x262   : > { %v1581_v24 = vshrl.u32 %v1571_v23, 16  ;;  %v1584_v26 = vshll.u32 %v1571_v23, 16 }
 0x264   : > { %v1583_v25 = vrot.slane %v1581_v24, 7 }
 0x266   : > { %v1586_v29 = vor.u32 %v1584_v26, %v1583_v25  ;;  %v1588_v16 = vrot.slane %v1583_v25, 4 }
 0x268   : > { %v1587_v31 = vsel %vm3329_vm10, %v1579_v27, %v1586_v29  ;;  %v1597_v32 = vsel %vm3306_vm2, %v1588_v16, %v1596_v30  ;;  %v2585_v34 = vld [vmem:[#allocation3] sm:$0xe]  ;;  %v1555_v57 = vpop.f32.mrf.mxu2 }
 0x269   : > { %1595 = vst [vmem:[#allocation3 + $0x4] sm:$0xf] %v1587_v31  ;;  %v1561_v0 = vadd.f32 %v1555_v57, %v1434_v61 }
 0x26a   : > { %1598 = vst [vmem:[#allocation3 + $0x8] sm:$0x1] %v1597_v32 }
 0x270   : > { %v2547_v58 = vld [vmem:[#allocation3] sm:$0xff] }
 0x271   : > { %v2584_v4 = vld [vmem:[#allocation3] sm:$0xf0]  ;;  %v1689_v19 = vld [vmem:[#allocation3 + $0x8] sm:$0x1]  ;;  %1679 = vmatmul.bf16.vlgmr.msrb.gmra.mxu3 %v2547_v58 }
 0x272   : > { %v2578_v33 = vld [vmem:[#allocation3] sm:$0xff]   ;;  %v1712_v37 = vunpack.c.l.b16 %v1689_v19  ;;  %v2586_v36 = vor.u32 %v2585_v34, %v2584_v4 }
 0x273   : > { %v1718_v35 = vshll.u32 %v2578_v33, 16  ;;  %v1716_v14 = vshrl.u32 %v2578_v33, 16 }
 0x274   : > { %v1714_v38 = vpack.c.b16 %v1712_v37, %v1712_v37  ;;  %v1813_v40 = vrot.slane %v2586_v36, 1 }
 0x275   : > { %v1720_v39 = vrot.slane %v1718_v35, 1 }
 0x276   : > { %v1814_v41 = vrot.slane %v1714_v38, 1  ;;  %v1723_v42 = vshll.u32 %v1714_v38, 16 }
 0x277   : > { %v1721_v43 = vor.u32 %v1720_v39, %v1716_v14 }
 0x278   : > { %v1815_v5 = vsel %vm1109_vm11, %v1813_v40, %v1814_v41  ;;  %v1725_v44 = vrot.slane %v1723_v42, 1 }
 0x279   : > { %1873 = vmatmul.bf16.vlgmr.msra.gmra.mxu1 %v1815_v5 }
 0x27a   : > { %v1726_v45 = vsel %vm1010_vm12, %v1721_v43, %v1725_v44 }
 0x27b   : > { %1784 = vmatmul.bf16.vlgmr.msra.gmra.mxu0 %v1726_v45 }
 0x2f4   : > { %v1680_v53 = vpop.f32.mrf.mxu3 }
 0x2f5   : > { %v1685_v54 = vadd.f32 %v1680_v53, %v1560_v52 }
 0x2f6   : > { %v1874_v55 = vpop.f32.mrf.mxu1 }
 0x2f8   : > { %v1785_v56 = vpop.f32.mrf.mxu0 }
 0x2f9   : > { %v1790_v59 = vadd.f32 %v1785_v56, %v1685_v54 }
 0x2fb   : > { %v1879_v62 = vadd.f32 %v1874_v55, %v1790_v59 }
 0x2fc   : > { %v1682_v2 = vpop.f32.mrf.mxu3 }
 0x2fd   : > { %v1883_v1 = vadd.f32 %v2716_v60, %v1879_v62  ;;  %v1686_v3 = vadd.f32 %v1682_v2, %v1561_v0 }
 0x2fe   : > { %v1876_v11 = vpop.f32.mrf.mxu1 }
 0x2ff   : > { %vm1885_vm1 = vcmp.ge.f32.partialorder %v1883_v1, 0.0  ;;  %v1889_v6 = vmul.f32 %v2717_v63, %v1883_v1 }
 0x300   : > { %v1787_v7 = vpop.f32.mrf.mxu0 }
 0x301   : > { %v1891_v8 = vsel %vm1885_vm1, %v1883_v1, %v1889_v6  ;;  %v1791_v9 = vadd.f32 %v1787_v7, %v1686_v3 }
 0x302   : > { %v1893_v10 = vadd.f32 %v1891_v8, %v3343_v22 }
 0x303   : > { %v1880_v12 = vadd.f32 %v1876_v11, %v1791_v9 }
 0x304   : > { %1895 = vst [vmem:[%s466_s13] sm:$0xff] %v1893_v10 }
 0x305   : > { %v1884_v13 = vadd.f32 %v2716_v60, %v1880_v12 }
 0x307   : > { %vm1886_vm2 = vcmp.ge.f32.partialorder %v1884_v13, 0.0  ;;  %v1890_v15 = vmul.f32 %v2717_v63, %v1884_v13 }
 0x309   : > { %v1892_v17 = vsel %vm1886_vm2, %v1884_v13, %v1890_v15 }
 0x30a   : > { %v1894_v22 = vadd.f32 %v1892_v17, %v3348_v28 }
 0x30c   : > { %1896 = vst [vmem:[%s466_s13 + $0x8] sm:$0xff] %v1894_v22 }
 0x30d   : > { %2985 = shalt.err (!%p2982_p9)
}
 0x30e   : > { %s3055_s15 = smov 128   ;;  %s3056_s3 = smov 8  }
 0x30f   : > { %2617 = dma.vmem_to_hbm [thread:$0]  (%p3221_p13), %s1911_s25, 256, %s1913_s26, %s1898_s16, %s3055_s15, %s3055_s15, %s3056_s3  }
 0x310 PF: > { %s1927_s28 = sand.u32 1, %s3028_s30   ;;  %p3442_p10 = scmp.ge.s32.totalorder %s3040_s12, 2 }
 0x311   : > { %s1928_s29 = scalar_lea.sflag [#allocation6], %s1927_s28 }
 0x312   : > { %p2646_p11 = pnand %p3442_p10, %p3226_p4 }
 0x314   : > { %p2647_p0 = pneg %p2646_p11 }
 0x316   : > { %3023 = dma.done.wait (%p2647_p0), %s1928_s29, 256  }
 0x317   : > { %3025 = vsyncadd (%p2647_p0), %s1928_s29, 4294967040  ;;  %p26_p2 = scmp.ge.s32.totalorder %s3201_s21, 4   ;;  %s3443_s30 = smov %s3032_s10 }
 0x318   : > { %s3444_s10 = smov %s3036_s11  ;;  %s3445_s11 = smov %s3213_s22 }
 0x319   : > { %s3446_s12 = smov %s3201_s21  ;;  %28 = sbr.rel (!%p26_p2) target bundleno = 13 (0xd), region = 141 }
 0x31e   :  { %1934 = vsyncpa [#allocation5], 1 }
 0x31f   :  { %1936 = vsyncpa [#allocation5 + $0x1], 1 }
 0x320   :  { %1937 = vsyncpa [#allocation8], 1 }
 0x321   :  { %1938 = vsyncpa [#allocation11], 1 }
 0x322   :  { %1939 = vsyncpa [#allocation14], 1 }
 0x323   :  { %1940 = vsyncpa [#allocation17], 1 }
 0x324   :  { %1941 = vsyncpa [#allocation6], 1 }
 0x325   :  { %1943 = vsyncpa [#allocation6 + $0x1], 1 }

</bundles_post_ra>
